<compile_context>
chip_gen: v7x
topology: tpu7x:2x2x1
jax: 0.10.0
libtpu: 0.0.40
codegen_flags: <defaults>
</compile_context>

<pallas_src>
import math

import jax
import jax.numpy as jnp
from jax import lax
from jax.experimental import pallas as pl
from jax.experimental.pallas import tpu as pltpu

SUBLANES = 8   # f32 sublane tile
LANES = 128    # lane tile


def _round_up(x, m):
    return ((x + m - 1) // m) * m


def _padded_f32_bytes(shape):
    rows = 1
    for d in shape[:-1]:
        rows *= d
    return _round_up(max(rows, 1), SUBLANES) * _round_up(shape[-1], LANES) * 4


# ----------------------------------------------------------------------------
# Fused kernel factory: all LSTM layers + output Linear in a single pallas_call.
#
# Ref order:
#   inputs : x_flat, (w_ih, w_hh, bias) * layers, w_lin, b_lin
#   outputs: y_padded
#   scratch: gx (rows, 4H) hoisted projections, hseq (rows, H) layer activations
# ----------------------------------------------------------------------------
def _make_fused_lstm_kernel(T, BP, H, layers, compute_dtype):
    G = 4 * H
    n_in = 3 + 3 * layers  # x + 3 refs per layer + linear w/b

    def kernel(*refs):
        x_ref = refs[0]
        w_lin_ref = refs[n_in - 2]
        b_lin_ref = refs[n_in - 1]
        o_ref = refs[n_in]
        gx_ref = refs[n_in + 1]      # (rows, 4H) f32 scratch
        hseq_ref = refs[n_in + 2]    # (rows, H)  f32 scratch

        # Lane-group mask: the cell-input gate 'g' occupies lanes [2H, 3H).
        lane = lax.broadcasted_iota(jnp.int32, (BP, G), 1)
        g_gate_mask = (lane >= 2 * H) & (lane < 3 * H)

        for layer in range(layers):
            w_ih_ref = refs[1 + 3 * layer]   # (I_l, 4H)  compute_dtype
            w_hh_ref = refs[2 + 3 * layer]   # (H, 4H)    compute_dtype
            b_ref = refs[3 + 3 * layer]      # (1, 4H)    f32 (b_ih + b_hh)

            # ---- Phase A: hoisted input projection (one lane-dense matmul,
            #      off the serial path).
            inp = x_ref[...] if layer == 0 else hseq_ref[...]
            gx_ref[...] = (
                jnp.dot(inp.astype(compute_dtype), w_ih_ref[...],
                        preferred_element_type=jnp.float32)
                + b_ref[...]
            )

            whh = w_hh_ref[...]   # (H, 4H), loaded once per layer

            # ---- Phase B: time recurrence — one MXU dot + packed gate math
            #      per step; full (8, lanes) tile loads/stores only.
            def step(t, carry):
                h, c = carry                         # f32 (BP, H) each
                row = pl.multiple_of(t * BP, BP)
                g = gx_ref[pl.ds(row, BP), :] + jnp.dot(
                    h.astype(compute_dtype), whh,
                    preferred_element_type=jnp.float32)      # (BP, 4H)
                sig = jax.nn.sigmoid(g)                       # one EUP pass
                th = jnp.tanh(g)                              # one EUP pass
                act = jnp.where(g_gate_mask, th, sig)
                i_t = act[:, 0 * H:1 * H]
                f_t = act[:, 1 * H:2 * H]
                g_t = act[:, 2 * H:3 * H]
                o_t = act[:, 3 * H:4 * H]
                c_new = f_t * c + i_t * g_t
                h_new = o_t * jnp.tanh(c_new)
                hseq_ref[pl.ds(row, BP), :] = h_new   # aligned full-tile store
                return h_new, c_new

            h0 = jnp.zeros((BP, H), jnp.float32)     # self.hidden is None -> zeros
            c0 = jnp.zeros((BP, H), jnp.float32)
            lax.fori_loop(0, T, step, (h0, c0), unroll=min(T, 8))

        # ---- Epilogue: output Linear over the whole (padded) sequence,
        #      lane-dense store.  Phantom rows produce finite, discarded values.
        # TODO(synk): row-tile this (and Phase A) for large T*B so it pipelines.
        o_ref[...] = (
            jnp.dot(hseq_ref[...].astype(compute_dtype), w_lin_ref[...],
                    preferred_element_type=jnp.float32)
            + b_lin_ref[...]
        )

    return kernel


# ----------------------------------------------------------------------------
# Forward wrapper: weight repacking (plain JAX) + single fused pallas_call.
# ----------------------------------------------------------------------------
def simple_recurrent_sequence_forward(params, data, use_bf16_matmul=True):
    """Forward of SimpleRecurrentSequence, future=0 (default) path.

    data: (T, B, in_size) f32 -> (T, B, out_size) f32
    """
    # TODO(synk): future > 1 autoregressive loop (re-feeding the output through
    # the LSTM) not implemented; the default forward(data) uses future=0.
    T, B, I = data.shape
    lstm_params = params["lstm"]
    layers = len(lstm_params)
    H = lstm_params[0]["w_hh"].shape[1]
    O = params["linear"]["w"].shape[0]
    O_pad = max(LANES, _round_up(O, LANES))
    BP = max(SUBLANES, _round_up(B, SUBLANES))   # sublane-padded batch
    cd = jnp.bfloat16 if use_bf16_matmul else jnp.float32
    rows = T * BP

    # Sublane-pad the batch with zero rows so per-timestep reads/stores hit full
    # (8, lanes) tiles.  Phantom rows are well-defined (zero-input batch).
    x_pad = jnp.zeros((T, BP, I), jnp.float32).at[:, :B, :].set(
        data.astype(jnp.float32))
    args = [x_pad.reshape(rows, I)]
    for lp in lstm_params:
        # Gates packed along lanes: [i | f | g | o], each H wide (4H = 128 lanes).
        args.append(jnp.transpose(lp["w_ih"]).astype(cd))            # (I_l, 4H)
        args.append(jnp.transpose(lp["w_hh"]).astype(cd))            # (H, 4H)
        args.append((lp["b_ih"] + lp["b_hh"]).reshape(1, 4 * H).astype(jnp.float32))
    w_lin, b_lin = params["linear"]["w"], params["linear"]["b"]
    args.append(jnp.zeros((H, O_pad), cd).at[:, :O].set(
        jnp.transpose(w_lin).astype(cd)))
    args.append(jnp.zeros((1, O_pad), jnp.float32).at[:, :O].set(b_lin.reshape(1, O)))

    def full_spec(a):
        nd = a.ndim
        return pl.BlockSpec(a.shape, lambda *_, nd=nd: (0,) * nd)

    # Resident VMEM footprint (gridless call -> single-buffered) with 2x margin.
    footprint = sum(_padded_f32_bytes(a.shape) for a in args)
    footprint += _padded_f32_bytes((rows, O_pad))    # output
    footprint += _padded_f32_bytes((rows, 4 * H))    # gx scratch
    footprint += _padded_f32_bytes((rows, H))        # hseq scratch
    vmem_limit = int(min(64 * 2**20, max(2 * footprint, 32 * 2**20)))

    kernel = _make_fused_lstm_kernel(T, BP, H, layers, cd)
    y = pl.pallas_call(
        kernel,
        out_shape=jax.ShapeDtypeStruct((rows, O_pad), jnp.float32),
        in_specs=[full_spec(a) for a in args],
        out_specs=pl.BlockSpec((rows, O_pad), lambda *_: (0, 0)),
        scratch_shapes=[pltpu.VMEM((rows, 4 * H), jnp.float32),
                        pltpu.VMEM((rows, H), jnp.float32)],
        compiler_params=pltpu.CompilerParams(vmem_limit_bytes=vmem_limit),
    )(*args)

    return y.reshape(T, BP, O_pad)[:, :B, :O]


# ----------------------------------------------------------------------------
# Parameter construction (mimics PyTorch's U(-1/sqrt(H), 1/sqrt(H)) init).
# ----------------------------------------------------------------------------
def init_params(key, in_size, hid_size, out_size, layers):
    params = {"lstm": []}
    stdv = 1.0 / math.sqrt(hid_size)
    for layer in range(layers):
        layer_in = in_size if layer == 0 else hid_size
        key, k1, k2, k3, k4 = jax.random.split(key, 5)
        params["lstm"].append({
            "w_ih": jax.random.uniform(k1, (4 * hid_size, layer_in), jnp.float32, -stdv, stdv),
            "w_hh": jax.random.uniform(k2, (4 * hid_size, hid_size), jnp.float32, -stdv, stdv),
            "b_ih": jax.random.uniform(k3, (4 * hid_size,), jnp.float32, -stdv, stdv),
            "b_hh": jax.random.uniform(k4, (4 * hid_size,), jnp.float32, -stdv, stdv),
        })
    key, k1, k2 = jax.random.split(key, 3)
    params["linear"] = {
        "w": jax.random.uniform(k1, (out_size, hid_size), jnp.float32, -stdv, stdv),
        "b": jax.random.uniform(k2, (out_size,), jnp.float32, -stdv, stdv),
    }
    return params


# ----------------------------------------------------------------------------
# Pure-JAX reference (numerical sanity check).
# ----------------------------------------------------------------------------
def _reference_forward(params, data):
    T, B, _ = data.shape
    out = data
    for lp in params["lstm"]:
        H = lp["w_hh"].shape[1]
        b = lp["b_ih"] + lp["b_hh"]
        h = jnp.zeros((B, H), jnp.float32)
        c = jnp.zeros((B, H), jnp.float32)
        ys = []
        for t in range(T):
            gates = out[t] @ lp["w_ih"].T + h @ lp["w_hh"].T + b
            i = jax.nn.sigmoid(gates[:, 0 * H:1 * H])
            f = jax.nn.sigmoid(gates[:, 1 * H:2 * H])
            g = jnp.tanh(gates[:, 2 * H:3 * H])
            o = jax.nn.sigmoid(gates[:, 3 * H:4 * H])
            c = f * c + i * g
            h = o * jnp.tanh(c)
            ys.append(h)
        out = jnp.stack(ys, 0)
    return out @ params["linear"]["w"].T + params["linear"]["b"]


if __name__ == "__main__":
    # seq=8, batch=2, in=8, hid=32, out=8, layers=2, cell='LSTM', batch_first=False.
    seq_len, batch, in_size, hid_size, out_size, layers = 8, 2, 8, 32, 8, 2

    key = jax.random.PRNGKey(0)
    key, data_key = jax.random.split(key)
    data = jax.random.normal(data_key, (seq_len, batch, in_size), jnp.float32)
    params = init_params(key, in_size, hid_size, out_size, layers)

    fwd = jax.jit(simple_recurrent_sequence_forward,
                  static_argnames=("use_bf16_matmul",))

    ref = _reference_forward(params, data)

    # Correctness check: f32 matmul path (tight tolerance).
    out_f32 = fwd(params, data, use_bf16_matmul=False)
    jax.block_until_ready((out_f32, ref))
    assert out_f32.shape == (seq_len, batch, out_size)
    assert bool(jnp.allclose(out_f32, ref, atol=1e-2, rtol=1e-2))

    # Correctness check: optimized bf16-operand path (loose tolerance; the
    # recurrent h is re-quantized to bf16 each step, c stays f32).
    result = fwd(params, data, use_bf16_matmul=True)
    jax.block_until_ready(result)
    assert result.shape == (seq_len, batch, out_size)
    assert result.dtype == jnp.float32
    assert bool(jnp.allclose(result, ref, atol=1e-1, rtol=1e-1))

    print("KERNEL_OK")
</pallas_src>

<mosaic_0001>
module attributes {stable_mosaic.version = 11 : i64} {
  func.func @kernel(%arg0: memref<64x8xf32, #tpu.memory_space<vmem>>, %arg1: memref<8x128xf32, #tpu.memory_space<vmem>>, %arg2: memref<32x128xf32, #tpu.memory_space<vmem>>, %arg3: memref<1x128xf32, #tpu.memory_space<vmem>>, %arg4: memref<32x128xf32, #tpu.memory_space<vmem>>, %arg5: memref<32x128xf32, #tpu.memory_space<vmem>>, %arg6: memref<1x128xf32, #tpu.memory_space<vmem>>, %arg7: memref<32x128xf32, #tpu.memory_space<vmem>>, %arg8: memref<1x128xf32, #tpu.memory_space<vmem>>, %arg9: memref<64x128xf32, #tpu.memory_space<vmem>>, %arg10: memref<64x128xf32, #tpu.memory_space<vmem>>, %arg11: memref<64x32xf32, #tpu.memory_space<vmem>>) attributes {dimension_semantics = [], scalar_prefetch = 0 : i64, scratch_operands = 2 : i64, tpu.core_type = #tpu.core_type<tc>} {
    %0 = tpu.iota {dimensions = array<i32: 1>} : vector<8x128xi32>
    %c64_i32 = arith.constant 64 : i32
    %1 = vector.broadcast %c64_i32 : i32 to vector<8x128xi32>
    %2 = arith.cmpi sge, %0, %1 : vector<8x128xi32>
    %c96_i32 = arith.constant 96 : i32
    %3 = vector.broadcast %c96_i32 : i32 to vector<8x128xi32>
    %4 = arith.cmpi slt, %0, %3 : vector<8x128xi32>
    %5 = arith.andi %2, %4 : vector<8x128xi1>
    %c0 = arith.constant 0 : index
    %c0_0 = arith.constant 0 : index
    %6 = vector.load %arg0[%c0, %c0_0] : memref<64x8xf32, #tpu.memory_space<vmem>>, vector<64x8xf32>
    %c0_1 = arith.constant 0 : index
    %c0_2 = arith.constant 0 : index
    %7 = vector.load %arg1[%c0_1, %c0_2] : memref<8x128xf32, #tpu.memory_space<vmem>>, vector<8x128xf32>
    %cst = arith.constant dense<0.000000e+00> : vector<64x128xf32>
    %8 = tpu.matmul %6, %7, %cst {dimension_numbers = #tpu.dot_dimension_numbers<[1], [0], [0], [1], [0, 0, 1, 1], [], []>} : vector<64x8xf32>, vector<8x128xf32>, vector<64x128xf32> -> vector<64x128xf32>
    %c0_3 = arith.constant 0 : index
    %c0_4 = arith.constant 0 : index
    %9 = vector.load %arg3[%c0_3, %c0_4] : memref<1x128xf32, #tpu.memory_space<vmem>>, vector<1x128xf32>
    %10 = vector.broadcast %9 : vector<1x128xf32> to vector<64x128xf32>
    %11 = arith.addf %8, %10 : vector<64x128xf32>
    %c0_5 = arith.constant 0 : index
    %c0_6 = arith.constant 0 : index
    %12 = vector.load %arg10[%c0_5, %c0_6] : memref<64x128xf32, #tpu.memory_space<vmem>>, vector<64x128xf32>
    tpu.vector_store %arg10[%c0_5, %c0_6], %11 {strides = array<i32>} : memref<64x128xf32, #tpu.memory_space<vmem>>, vector<64x128xf32>,
    %c0_7 = arith.constant 0 : index
    %c0_8 = arith.constant 0 : index
    %13 = vector.load %arg2[%c0_7, %c0_8] : memref<32x128xf32, #tpu.memory_space<vmem>>, vector<32x128xf32>
    %cst_9 = arith.constant 0.000000e+00 : f32
    %14 = vector.broadcast %cst_9 : f32 to vector<8x32xf32>
    %cst_10 = arith.constant 0.000000e+00 : f32
    %15 = vector.broadcast %cst_10 : f32 to vector<8x32xf32>
    %c0_i32 = arith.constant 0 : i32
    %c8_i32 = arith.constant 8 : i32
    %16 = arith.muli %c0_i32, %c8_i32 : i32
    %17 = tpu.assume_multiple %16, 8 : i32
    %18 = arith.index_cast %17 : i32 to index
    %c0_11 = arith.constant 0 : index
    %19 = vector.load %arg10[%18, %c0_11] : memref<64x128xf32, #tpu.memory_space<vmem>>, vector<8x128xf32>
    %cst_12 = arith.constant dense<0.000000e+00> : vector<8x128xf32>
    %20 = tpu.matmul %14, %13, %cst_12 {dimension_numbers = #tpu.dot_dimension_numbers<[1], [0], [0], [1], [0, 0, 1, 1], [], []>} : vector<8x32xf32>, vector<32x128xf32>, vector<8x128xf32> -> vector<8x128xf32>
    %21 = arith.addf %19, %20 : vector<8x128xf32>
    %22 = arith.negf %21 : vector<8x128xf32>
    %23 = math.exp %22 : vector<8x128xf32>
    %cst_13 = arith.constant 1.000000e+00 : f32
    %24 = vector.broadcast %cst_13 : f32 to vector<8x128xf32>
    %25 = arith.addf %24, %23 : vector<8x128xf32>
    %26 = arith.divf %24, %25 : vector<8x128xf32>
    %27 = math.tanh %21 : vector<8x128xf32>
    %28 = arith.select %5, %27, %26 : vector<8x128xi1>, vector<8x128xf32>
    %29 = vector.extract_strided_slice %28 {offsets = [0, 0], sizes = [8, 32], strides = [1, 1]} : vector<8x128xf32> to vector<8x32xf32>
    %30 = vector.extract_strided_slice %28 {offsets = [0, 32], sizes = [8, 32], strides = [1, 1]} : vector<8x128xf32> to vector<8x32xf32>
    %31 = vector.extract_strided_slice %28 {offsets = [0, 64], sizes = [8, 32], strides = [1, 1]} : vector<8x128xf32> to vector<8x32xf32>
    %32 = vector.extract_strided_slice %28 {offsets = [0, 96], sizes = [8, 32], strides = [1, 1]} : vector<8x128xf32> to vector<8x32xf32>
    %33 = arith.mulf %30, %15 : vector<8x32xf32>
    %34 = arith.mulf %29, %31 : vector<8x32xf32>
    %35 = arith.addf %33, %34 : vector<8x32xf32>
    %36 = math.tanh %35 : vector<8x32xf32>
    %37 = arith.mulf %32, %36 : vector<8x32xf32>
    %38 = arith.index_cast %17 : i32 to index
    %c0_14 = arith.constant 0 : index
    %39 = vector.load %arg11[%38, %c0_14] : memref<64x32xf32, #tpu.memory_space<vmem>>, vector<8x32xf32>
    tpu.vector_store %arg11[%38, %c0_14], %37 {strides = array<i32>} : memref<64x32xf32, #tpu.memory_space<vmem>>, vector<8x32xf32>,
    %c1_i32 = arith.constant 1 : i32
    %c8_i32_15 = arith.constant 8 : i32
    %40 = arith.muli %c1_i32, %c8_i32_15 : i32
    %41 = tpu.assume_multiple %40, 8 : i32
    %42 = arith.index_cast %41 : i32 to index
    %c0_16 = arith.constant 0 : index
    %43 = vector.load %arg10[%42, %c0_16] : memref<64x128xf32, #tpu.memory_space<vmem>>, vector<8x128xf32>
    %cst_17 = arith.constant dense<0.000000e+00> : vector<8x128xf32>
    %44 = tpu.matmul %37, %13, %cst_17 {dimension_numbers = #tpu.dot_dimension_numbers<[1], [0], [0], [1], [0, 0, 1, 1], [], []>} : vector<8x32xf32>, vector<32x128xf32>, vector<8x128xf32> -> vector<8x128xf32>
    %45 = arith.addf %43, %44 : vector<8x128xf32>
    %46 = arith.negf %45 : vector<8x128xf32>
    %47 = math.exp %46 : vector<8x128xf32>
    %cst_18 = arith.constant 1.000000e+00 : f32
    %48 = vector.broadcast %cst_18 : f32 to vector<8x128xf32>
    %49 = arith.addf %48, %47 : vector<8x128xf32>
    %50 = arith.divf %48, %49 : vector<8x128xf32>
    %51 = math.tanh %45 : vector<8x128xf32>
    %52 = arith.select %5, %51, %50 : vector<8x128xi1>, vector<8x128xf32>
    %53 = vector.extract_strided_slice %52 {offsets = [0, 0], sizes = [8, 32], strides = [1, 1]} : vector<8x128xf32> to vector<8x32xf32>
    %54 = vector.extract_strided_slice %52 {offsets = [0, 32], sizes = [8, 32], strides = [1, 1]} : vector<8x128xf32> to vector<8x32xf32>
    %55 = vector.extract_strided_slice %52 {offsets = [0, 64], sizes = [8, 32], strides = [1, 1]} : vector<8x128xf32> to vector<8x32xf32>
    %56 = vector.extract_strided_slice %52 {offsets = [0, 96], sizes = [8, 32], strides = [1, 1]} : vector<8x128xf32> to vector<8x32xf32>
    %57 = arith.mulf %54, %35 : vector<8x32xf32>
    %58 = arith.mulf %53, %55 : vector<8x32xf32>
    %59 = arith.addf %57, %58 : vector<8x32xf32>
    %60 = math.tanh %59 : vector<8x32xf32>
    %61 = arith.mulf %56, %60 : vector<8x32xf32>
    %62 = arith.index_cast %41 : i32 to index
    %c0_19 = arith.constant 0 : index
    %63 = vector.load %arg11[%62, %c0_19] : memref<64x32xf32, #tpu.memory_space<vmem>>, vector<8x32xf32>
    tpu.vector_store %arg11[%62, %c0_19], %61 {strides = array<i32>} : memref<64x32xf32, #tpu.memory_space<vmem>>, vector<8x32xf32>,
    %c2_i32 = arith.constant 2 : i32
    %c8_i32_20 = arith.constant 8 : i32
    %64 = arith.muli %c2_i32, %c8_i32_20 : i32
    %65 = tpu.assume_multiple %64, 8 : i32
    %66 = arith.index_cast %65 : i32 to index
    %c0_21 = arith.constant 0 : index
    %67 = vector.load %arg10[%66, %c0_21] : memref<64x128xf32, #tpu.memory_space<vmem>>, vector<8x128xf32>
    %cst_22 = arith.constant dense<0.000000e+00> : vector<8x128xf32>
    %68 = tpu.matmul %61, %13, %cst_22 {dimension_numbers = #tpu.dot_dimension_numbers<[1], [0], [0], [1], [0, 0, 1, 1], [], []>} : vector<8x32xf32>, vector<32x128xf32>, vector<8x128xf32> -> vector<8x128xf32>
    %69 = arith.addf %67, %68 : vector<8x128xf32>
    %70 = arith.negf %69 : vector<8x128xf32>
    %71 = math.exp %70 : vector<8x128xf32>
    %cst_23 = arith.constant 1.000000e+00 : f32
    %72 = vector.broadcast %cst_23 : f32 to vector<8x128xf32>
    %73 = arith.addf %72, %71 : vector<8x128xf32>
    %74 = arith.divf %72, %73 : vector<8x128xf32>
    %75 = math.tanh %69 : vector<8x128xf32>
    %76 = arith.select %5, %75, %74 : vector<8x128xi1>, vector<8x128xf32>
    %77 = vector.extract_strided_slice %76 {offsets = [0, 0], sizes = [8, 32], strides = [1, 1]} : vector<8x128xf32> to vector<8x32xf32>
    %78 = vector.extract_strided_slice %76 {offsets = [0, 32], sizes = [8, 32], strides = [1, 1]} : vector<8x128xf32> to vector<8x32xf32>
    %79 = vector.extract_strided_slice %76 {offsets = [0, 64], sizes = [8, 32], strides = [1, 1]} : vector<8x128xf32> to vector<8x32xf32>
    %80 = vector.extract_strided_slice %76 {offsets = [0, 96], sizes = [8, 32], strides = [1, 1]} : vector<8x128xf32> to vector<8x32xf32>
    %81 = arith.mulf %78, %59 : vector<8x32xf32>
    %82 = arith.mulf %77, %79 : vector<8x32xf32>
    %83 = arith.addf %81, %82 : vector<8x32xf32>
    %84 = math.tanh %83 : vector<8x32xf32>
    %85 = arith.mulf %80, %84 : vector<8x32xf32>
    %86 = arith.index_cast %65 : i32 to index
    %c0_24 = arith.constant 0 : index
    %87 = vector.load %arg11[%86, %c0_24] : memref<64x32xf32, #tpu.memory_space<vmem>>, vector<8x32xf32>
    tpu.vector_store %arg11[%86, %c0_24], %85 {strides = array<i32>} : memref<64x32xf32, #tpu.memory_space<vmem>>, vector<8x32xf32>,
    %c3_i32 = arith.constant 3 : i32
    %c8_i32_25 = arith.constant 8 : i32
    %88 = arith.muli %c3_i32, %c8_i32_25 : i32
    %89 = tpu.assume_multiple %88, 8 : i32
    %90 = arith.index_cast %89 : i32 to index
    %c0_26 = arith.constant 0 : index
    %91 = vector.load %arg10[%90, %c0_26] : memref<64x128xf32, #tpu.memory_space<vmem>>, vector<8x128xf32>
    %cst_27 = arith.constant dense<0.000000e+00> : vector<8x128xf32>
    %92 = tpu.matmul %85, %13, %cst_27 {dimension_numbers = #tpu.dot_dimension_numbers<[1], [0], [0], [1], [0, 0, 1, 1], [], []>} : vector<8x32xf32>, vector<32x128xf32>, vector<8x128xf32> -> vector<8x128xf32>
    %93 = arith.addf %91, %92 : vector<8x128xf32>
    %94 = arith.negf %93 : vector<8x128xf32>
    %95 = math.exp %94 : vector<8x128xf32>
    %cst_28 = arith.constant 1.000000e+00 : f32
    %96 = vector.broadcast %cst_28 : f32 to vector<8x128xf32>
    %97 = arith.addf %96, %95 : vector<8x128xf32>
    %98 = arith.divf %96, %97 : vector<8x128xf32>
    %99 = math.tanh %93 : vector<8x128xf32>
    %100 = arith.select %5, %99, %98 : vector<8x128xi1>, vector<8x128xf32>
    %101 = vector.extract_strided_slice %100 {offsets = [0, 0], sizes = [8, 32], strides = [1, 1]} : vector<8x128xf32> to vector<8x32xf32>
    %102 = vector.extract_strided_slice %100 {offsets = [0, 32], sizes = [8, 32], strides = [1, 1]} : vector<8x128xf32> to vector<8x32xf32>
    %103 = vector.extract_strided_slice %100 {offsets = [0, 64], sizes = [8, 32], strides = [1, 1]} : vector<8x128xf32> to vector<8x32xf32>
    %104 = vector.extract_strided_slice %100 {offsets = [0, 96], sizes = [8, 32], strides = [1, 1]} : vector<8x128xf32> to vector<8x32xf32>
    %105 = arith.mulf %102, %83 : vector<8x32xf32>
    %106 = arith.mulf %101, %103 : vector<8x32xf32>
    %107 = arith.addf %105, %106 : vector<8x32xf32>
    %108 = math.tanh %107 : vector<8x32xf32>
    %109 = arith.mulf %104, %108 : vector<8x32xf32>
    %110 = arith.index_cast %89 : i32 to index
    %c0_29 = arith.constant 0 : index
    %111 = vector.load %arg11[%110, %c0_29] : memref<64x32xf32, #tpu.memory_space<vmem>>, vector<8x32xf32>
    tpu.vector_store %arg11[%110, %c0_29], %109 {strides = array<i32>} : memref<64x32xf32, #tpu.memory_space<vmem>>, vector<8x32xf32>,
    %c4_i32 = arith.constant 4 : i32
    %c8_i32_30 = arith.constant 8 : i32
    %112 = arith.muli %c4_i32, %c8_i32_30 : i32
    %113 = tpu.assume_multiple %112, 8 : i32
    %114 = arith.index_cast %113 : i32 to index
    %c0_31 = arith.constant 0 : index
    %115 = vector.load %arg10[%114, %c0_31] : memref<64x128xf32, #tpu.memory_space<vmem>>, vector<8x128xf32>
    %cst_32 = arith.constant dense<0.000000e+00> : vector<8x128xf32>
    %116 = tpu.matmul %109, %13, %cst_32 {dimension_numbers = #tpu.dot_dimension_numbers<[1], [0], [0], [1], [0, 0, 1, 1], [], []>} : vector<8x32xf32>, vector<32x128xf32>, vector<8x128xf32> -> vector<8x128xf32>
    %117 = arith.addf %115, %116 : vector<8x128xf32>
    %118 = arith.negf %117 : vector<8x128xf32>
    %119 = math.exp %118 : vector<8x128xf32>
    %cst_33 = arith.constant 1.000000e+00 : f32
    %120 = vector.broadcast %cst_33 : f32 to vector<8x128xf32>
    %121 = arith.addf %120, %119 : vector<8x128xf32>
    %122 = arith.divf %120, %121 : vector<8x128xf32>
    %123 = math.tanh %117 : vector<8x128xf32>
    %124 = arith.select %5, %123, %122 : vector<8x128xi1>, vector<8x128xf32>
    %125 = vector.extract_strided_slice %124 {offsets = [0, 0], sizes = [8, 32], strides = [1, 1]} : vector<8x128xf32> to vector<8x32xf32>
    %126 = vector.extract_strided_slice %124 {offsets = [0, 32], sizes = [8, 32], strides = [1, 1]} : vector<8x128xf32> to vector<8x32xf32>
    %127 = vector.extract_strided_slice %124 {offsets = [0, 64], sizes = [8, 32], strides = [1, 1]} : vector<8x128xf32> to vector<8x32xf32>
    %128 = vector.extract_strided_slice %124 {offsets = [0, 96], sizes = [8, 32], strides = [1, 1]} : vector<8x128xf32> to vector<8x32xf32>
    %129 = arith.mulf %126, %107 : vector<8x32xf32>
    %130 = arith.mulf %125, %127 : vector<8x32xf32>
    %131 = arith.addf %129, %130 : vector<8x32xf32>
    %132 = math.tanh %131 : vector<8x32xf32>
    %133 = arith.mulf %128, %132 : vector<8x32xf32>
    %134 = arith.index_cast %113 : i32 to index
    %c0_34 = arith.constant 0 : index
    %135 = vector.load %arg11[%134, %c0_34] : memref<64x32xf32, #tpu.memory_space<vmem>>, vector<8x32xf32>
    tpu.vector_store %arg11[%134, %c0_34], %133 {strides = array<i32>} : memref<64x32xf32, #tpu.memory_space<vmem>>, vector<8x32xf32>,
    %c5_i32 = arith.constant 5 : i32
    %c8_i32_35 = arith.constant 8 : i32
    %136 = arith.muli %c5_i32, %c8_i32_35 : i32
    %137 = tpu.assume_multiple %136, 8 : i32
    %138 = arith.index_cast %137 : i32 to index
    %c0_36 = arith.constant 0 : index
    %139 = vector.load %arg10[%138, %c0_36] : memref<64x128xf32, #tpu.memory_space<vmem>>, vector<8x128xf32>
    %cst_37 = arith.constant dense<0.000000e+00> : vector<8x128xf32>
    %140 = tpu.matmul %133, %13, %cst_37 {dimension_numbers = #tpu.dot_dimension_numbers<[1], [0], [0], [1], [0, 0, 1, 1], [], []>} : vector<8x32xf32>, vector<32x128xf32>, vector<8x128xf32> -> vector<8x128xf32>
    %141 = arith.addf %139, %140 : vector<8x128xf32>
    %142 = arith.negf %141 : vector<8x128xf32>
    %143 = math.exp %142 : vector<8x128xf32>
    %cst_38 = arith.constant 1.000000e+00 : f32
    %144 = vector.broadcast %cst_38 : f32 to vector<8x128xf32>
    %145 = arith.addf %144, %143 : vector<8x128xf32>
    %146 = arith.divf %144, %145 : vector<8x128xf32>
    %147 = math.tanh %141 : vector<8x128xf32>
    %148 = arith.select %5, %147, %146 : vector<8x128xi1>, vector<8x128xf32>
    %149 = vector.extract_strided_slice %148 {offsets = [0, 0], sizes = [8, 32], strides = [1, 1]} : vector<8x128xf32> to vector<8x32xf32>
    %150 = vector.extract_strided_slice %148 {offsets = [0, 32], sizes = [8, 32], strides = [1, 1]} : vector<8x128xf32> to vector<8x32xf32>
    %151 = vector.extract_strided_slice %148 {offsets = [0, 64], sizes = [8, 32], strides = [1, 1]} : vector<8x128xf32> to vector<8x32xf32>
    %152 = vector.extract_strided_slice %148 {offsets = [0, 96], sizes = [8, 32], strides = [1, 1]} : vector<8x128xf32> to vector<8x32xf32>
    %153 = arith.mulf %150, %131 : vector<8x32xf32>
    %154 = arith.mulf %149, %151 : vector<8x32xf32>
    %155 = arith.addf %153, %154 : vector<8x32xf32>
    %156 = math.tanh %155 : vector<8x32xf32>
    %157 = arith.mulf %152, %156 : vector<8x32xf32>
    %158 = arith.index_cast %137 : i32 to index
    %c0_39 = arith.constant 0 : index
    %159 = vector.load %arg11[%158, %c0_39] : memref<64x32xf32, #tpu.memory_space<vmem>>, vector<8x32xf32>
    tpu.vector_store %arg11[%158, %c0_39], %157 {strides = array<i32>} : memref<64x32xf32, #tpu.memory_space<vmem>>, vector<8x32xf32>,
    %c6_i32 = arith.constant 6 : i32
    %c8_i32_40 = arith.constant 8 : i32
    %160 = arith.muli %c6_i32, %c8_i32_40 : i32
    %161 = tpu.assume_multiple %160, 8 : i32
    %162 = arith.index_cast %161 : i32 to index
    %c0_41 = arith.constant 0 : index
    %163 = vector.load %arg10[%162, %c0_41] : memref<64x128xf32, #tpu.memory_space<vmem>>, vector<8x128xf32>
    %cst_42 = arith.constant dense<0.000000e+00> : vector<8x128xf32>
    %164 = tpu.matmul %157, %13, %cst_42 {dimension_numbers = #tpu.dot_dimension_numbers<[1], [0], [0], [1], [0, 0, 1, 1], [], []>} : vector<8x32xf32>, vector<32x128xf32>, vector<8x128xf32> -> vector<8x128xf32>
    %165 = arith.addf %163, %164 : vector<8x128xf32>
    %166 = arith.negf %165 : vector<8x128xf32>
    %167 = math.exp %166 : vector<8x128xf32>
    %cst_43 = arith.constant 1.000000e+00 : f32
    %168 = vector.broadcast %cst_43 : f32 to vector<8x128xf32>
    %169 = arith.addf %168, %167 : vector<8x128xf32>
    %170 = arith.divf %168, %169 : vector<8x128xf32>
    %171 = math.tanh %165 : vector<8x128xf32>
    %172 = arith.select %5, %171, %170 : vector<8x128xi1>, vector<8x128xf32>
    %173 = vector.extract_strided_slice %172 {offsets = [0, 0], sizes = [8, 32], strides = [1, 1]} : vector<8x128xf32> to vector<8x32xf32>
    %174 = vector.extract_strided_slice %172 {offsets = [0, 32], sizes = [8, 32], strides = [1, 1]} : vector<8x128xf32> to vector<8x32xf32>
    %175 = vector.extract_strided_slice %172 {offsets = [0, 64], sizes = [8, 32], strides = [1, 1]} : vector<8x128xf32> to vector<8x32xf32>
    %176 = vector.extract_strided_slice %172 {offsets = [0, 96], sizes = [8, 32], strides = [1, 1]} : vector<8x128xf32> to vector<8x32xf32>
    %177 = arith.mulf %174, %155 : vector<8x32xf32>
    %178 = arith.mulf %173, %175 : vector<8x32xf32>
    %179 = arith.addf %177, %178 : vector<8x32xf32>
    %180 = math.tanh %179 : vector<8x32xf32>
    %181 = arith.mulf %176, %180 : vector<8x32xf32>
    %182 = arith.index_cast %161 : i32 to index
    %c0_44 = arith.constant 0 : index
    %183 = vector.load %arg11[%182, %c0_44] : memref<64x32xf32, #tpu.memory_space<vmem>>, vector<8x32xf32>
    tpu.vector_store %arg11[%182, %c0_44], %181 {strides = array<i32>} : memref<64x32xf32, #tpu.memory_space<vmem>>, vector<8x32xf32>,
    %c7_i32 = arith.constant 7 : i32
    %c8_i32_45 = arith.constant 8 : i32
    %184 = arith.muli %c7_i32, %c8_i32_45 : i32
    %185 = tpu.assume_multiple %184, 8 : i32
    %186 = arith.index_cast %185 : i32 to index
    %c0_46 = arith.constant 0 : index
    %187 = vector.load %arg10[%186, %c0_46] : memref<64x128xf32, #tpu.memory_space<vmem>>, vector<8x128xf32>
    %cst_47 = arith.constant dense<0.000000e+00> : vector<8x128xf32>
    %188 = tpu.matmul %181, %13, %cst_47 {dimension_numbers = #tpu.dot_dimension_numbers<[1], [0], [0], [1], [0, 0, 1, 1], [], []>} : vector<8x32xf32>, vector<32x128xf32>, vector<8x128xf32> -> vector<8x128xf32>
    %189 = arith.addf %187, %188 : vector<8x128xf32>
    %190 = arith.negf %189 : vector<8x128xf32>
    %191 = math.exp %190 : vector<8x128xf32>
    %cst_48 = arith.constant 1.000000e+00 : f32
    %192 = vector.broadcast %cst_48 : f32 to vector<8x128xf32>
    %193 = arith.addf %192, %191 : vector<8x128xf32>
    %194 = arith.divf %192, %193 : vector<8x128xf32>
    %195 = math.tanh %189 : vector<8x128xf32>
    %196 = arith.select %5, %195, %194 : vector<8x128xi1>, vector<8x128xf32>
    %197 = vector.extract_strided_slice %196 {offsets = [0, 0], sizes = [8, 32], strides = [1, 1]} : vector<8x128xf32> to vector<8x32xf32>
    %198 = vector.extract_strided_slice %196 {offsets = [0, 32], sizes = [8, 32], strides = [1, 1]} : vector<8x128xf32> to vector<8x32xf32>
    %199 = vector.extract_strided_slice %196 {offsets = [0, 64], sizes = [8, 32], strides = [1, 1]} : vector<8x128xf32> to vector<8x32xf32>
    %200 = vector.extract_strided_slice %196 {offsets = [0, 96], sizes = [8, 32], strides = [1, 1]} : vector<8x128xf32> to vector<8x32xf32>
    %201 = arith.mulf %198, %179 : vector<8x32xf32>
    %202 = arith.mulf %197, %199 : vector<8x32xf32>
    %203 = arith.addf %201, %202 : vector<8x32xf32>
    %204 = math.tanh %203 : vector<8x32xf32>
    %205 = arith.mulf %200, %204 : vector<8x32xf32>
    %206 = arith.index_cast %185 : i32 to index
    %c0_49 = arith.constant 0 : index
    %207 = vector.load %arg11[%206, %c0_49] : memref<64x32xf32, #tpu.memory_space<vmem>>, vector<8x32xf32>
    tpu.vector_store %arg11[%206, %c0_49], %205 {strides = array<i32>} : memref<64x32xf32, #tpu.memory_space<vmem>>, vector<8x32xf32>,
    %c8_i32_50 = arith.constant 8 : i32
    %c0_51 = arith.constant 0 : index
    %c0_52 = arith.constant 0 : index
    %208 = vector.load %arg11[%c0_51, %c0_52] : memref<64x32xf32, #tpu.memory_space<vmem>>, vector<64x32xf32>
    %c0_53 = arith.constant 0 : index
    %c0_54 = arith.constant 0 : index
    %209 = vector.load %arg4[%c0_53, %c0_54] : memref<32x128xf32, #tpu.memory_space<vmem>>, vector<32x128xf32>
    %cst_55 = arith.constant dense<0.000000e+00> : vector<64x128xf32>
    %210 = tpu.matmul %208, %209, %cst_55 {dimension_numbers = #tpu.dot_dimension_numbers<[1], [0], [0], [1], [0, 0, 1, 1], [], []>} : vector<64x32xf32>, vector<32x128xf32>, vector<64x128xf32> -> vector<64x128xf32>
    %c0_56 = arith.constant 0 : index
    %c0_57 = arith.constant 0 : index
    %211 = vector.load %arg6[%c0_56, %c0_57] : memref<1x128xf32, #tpu.memory_space<vmem>>, vector<1x128xf32>
    %212 = vector.broadcast %211 : vector<1x128xf32> to vector<64x128xf32>
    %213 = arith.addf %210, %212 : vector<64x128xf32>
    %c0_58 = arith.constant 0 : index
    %c0_59 = arith.constant 0 : index
    %214 = vector.load %arg10[%c0_58, %c0_59] : memref<64x128xf32, #tpu.memory_space<vmem>>, vector<64x128xf32>
    tpu.vector_store %arg10[%c0_58, %c0_59], %213 {strides = array<i32>} : memref<64x128xf32, #tpu.memory_space<vmem>>, vector<64x128xf32>,
    %c0_60 = arith.constant 0 : index
    %c0_61 = arith.constant 0 : index
    %215 = vector.load %arg5[%c0_60, %c0_61] : memref<32x128xf32, #tpu.memory_space<vmem>>, vector<32x128xf32>
    %cst_62 = arith.constant 0.000000e+00 : f32
    %216 = vector.broadcast %cst_62 : f32 to vector<8x32xf32>
    %cst_63 = arith.constant 0.000000e+00 : f32
    %217 = vector.broadcast %cst_63 : f32 to vector<8x32xf32>
    %c0_i32_64 = arith.constant 0 : i32
    %c8_i32_65 = arith.constant 8 : i32
    %218 = arith.muli %c0_i32_64, %c8_i32_65 : i32
    %219 = tpu.assume_multiple %218, 8 : i32
    %220 = arith.index_cast %219 : i32 to index
    %c0_66 = arith.constant 0 : index
    %221 = vector.load %arg10[%220, %c0_66] : memref<64x128xf32, #tpu.memory_space<vmem>>, vector<8x128xf32>
    %cst_67 = arith.constant dense<0.000000e+00> : vector<8x128xf32>
    %222 = tpu.matmul %216, %215, %cst_67 {dimension_numbers = #tpu.dot_dimension_numbers<[1], [0], [0], [1], [0, 0, 1, 1], [], []>} : vector<8x32xf32>, vector<32x128xf32>, vector<8x128xf32> -> vector<8x128xf32>
    %223 = arith.addf %221, %222 : vector<8x128xf32>
    %224 = arith.negf %223 : vector<8x128xf32>
    %225 = math.exp %224 : vector<8x128xf32>
    %cst_68 = arith.constant 1.000000e+00 : f32
    %226 = vector.broadcast %cst_68 : f32 to vector<8x128xf32>
    %227 = arith.addf %226, %225 : vector<8x128xf32>
    %228 = arith.divf %226, %227 : vector<8x128xf32>
    %229 = math.tanh %223 : vector<8x128xf32>
    %230 = arith.select %5, %229, %228 : vector<8x128xi1>, vector<8x128xf32>
    %231 = vector.extract_strided_slice %230 {offsets = [0, 0], sizes = [8, 32], strides = [1, 1]} : vector<8x128xf32> to vector<8x32xf32>
    %232 = vector.extract_strided_slice %230 {offsets = [0, 32], sizes = [8, 32], strides = [1, 1]} : vector<8x128xf32> to vector<8x32xf32>
    %233 = vector.extract_strided_slice %230 {offsets = [0, 64], sizes = [8, 32], strides = [1, 1]} : vector<8x128xf32> to vector<8x32xf32>
    %234 = vector.extract_strided_slice %230 {offsets = [0, 96], sizes = [8, 32], strides = [1, 1]} : vector<8x128xf32> to vector<8x32xf32>
    %235 = arith.mulf %232, %217 : vector<8x32xf32>
    %236 = arith.mulf %231, %233 : vector<8x32xf32>
    %237 = arith.addf %235, %236 : vector<8x32xf32>
    %238 = math.tanh %237 : vector<8x32xf32>
    %239 = arith.mulf %234, %238 : vector<8x32xf32>
    %240 = arith.index_cast %219 : i32 to index
    %c0_69 = arith.constant 0 : index
    %241 = vector.load %arg11[%240, %c0_69] : memref<64x32xf32, #tpu.memory_space<vmem>>, vector<8x32xf32>
    tpu.vector_store %arg11[%240, %c0_69], %239 {strides = array<i32>} : memref<64x32xf32, #tpu.memory_space<vmem>>, vector<8x32xf32>,
    %c1_i32_70 = arith.constant 1 : i32
    %c8_i32_71 = arith.constant 8 : i32
    %242 = arith.muli %c1_i32_70, %c8_i32_71 : i32
    %243 = tpu.assume_multiple %242, 8 : i32
    %244 = arith.index_cast %243 : i32 to index
    %c0_72 = arith.constant 0 : index
    %245 = vector.load %arg10[%244, %c0_72] : memref<64x128xf32, #tpu.memory_space<vmem>>, vector<8x128xf32>
    %cst_73 = arith.constant dense<0.000000e+00> : vector<8x128xf32>
    %246 = tpu.matmul %239, %215, %cst_73 {dimension_numbers = #tpu.dot_dimension_numbers<[1], [0], [0], [1], [0, 0, 1, 1], [], []>} : vector<8x32xf32>, vector<32x128xf32>, vector<8x128xf32> -> vector<8x128xf32>
    %247 = arith.addf %245, %246 : vector<8x128xf32>
    %248 = arith.negf %247 : vector<8x128xf32>
    %249 = math.exp %248 : vector<8x128xf32>
    %cst_74 = arith.constant 1.000000e+00 : f32
    %250 = vector.broadcast %cst_74 : f32 to vector<8x128xf32>
    %251 = arith.addf %250, %249 : vector<8x128xf32>
    %252 = arith.divf %250, %251 : vector<8x128xf32>
    %253 = math.tanh %247 : vector<8x128xf32>
    %254 = arith.select %5, %253, %252 : vector<8x128xi1>, vector<8x128xf32>
    %255 = vector.extract_strided_slice %254 {offsets = [0, 0], sizes = [8, 32], strides = [1, 1]} : vector<8x128xf32> to vector<8x32xf32>
    %256 = vector.extract_strided_slice %254 {offsets = [0, 32], sizes = [8, 32], strides = [1, 1]} : vector<8x128xf32> to vector<8x32xf32>
    %257 = vector.extract_strided_slice %254 {offsets = [0, 64], sizes = [8, 32], strides = [1, 1]} : vector<8x128xf32> to vector<8x32xf32>
    %258 = vector.extract_strided_slice %254 {offsets = [0, 96], sizes = [8, 32], strides = [1, 1]} : vector<8x128xf32> to vector<8x32xf32>
    %259 = arith.mulf %256, %237 : vector<8x32xf32>
    %260 = arith.mulf %255, %257 : vector<8x32xf32>
    %261 = arith.addf %259, %260 : vector<8x32xf32>
    %262 = math.tanh %261 : vector<8x32xf32>
    %263 = arith.mulf %258, %262 : vector<8x32xf32>
    %264 = arith.index_cast %243 : i32 to index
    %c0_75 = arith.constant 0 : index
    %265 = vector.load %arg11[%264, %c0_75] : memref<64x32xf32, #tpu.memory_space<vmem>>, vector<8x32xf32>
    tpu.vector_store %arg11[%264, %c0_75], %263 {strides = array<i32>} : memref<64x32xf32, #tpu.memory_space<vmem>>, vector<8x32xf32>,
    %c2_i32_76 = arith.constant 2 : i32
    %c8_i32_77 = arith.constant 8 : i32
    %266 = arith.muli %c2_i32_76, %c8_i32_77 : i32
    %267 = tpu.assume_multiple %266, 8 : i32
    %268 = arith.index_cast %267 : i32 to index
    %c0_78 = arith.constant 0 : index
    %269 = vector.load %arg10[%268, %c0_78] : memref<64x128xf32, #tpu.memory_space<vmem>>, vector<8x128xf32>
    %cst_79 = arith.constant dense<0.000000e+00> : vector<8x128xf32>
    %270 = tpu.matmul %263, %215, %cst_79 {dimension_numbers = #tpu.dot_dimension_numbers<[1], [0], [0], [1], [0, 0, 1, 1], [], []>} : vector<8x32xf32>, vector<32x128xf32>, vector<8x128xf32> -> vector<8x128xf32>
    %271 = arith.addf %269, %270 : vector<8x128xf32>
    %272 = arith.negf %271 : vector<8x128xf32>
    %273 = math.exp %272 : vector<8x128xf32>
    %cst_80 = arith.constant 1.000000e+00 : f32
    %274 = vector.broadcast %cst_80 : f32 to vector<8x128xf32>
    %275 = arith.addf %274, %273 : vector<8x128xf32>
    %276 = arith.divf %274, %275 : vector<8x128xf32>
    %277 = math.tanh %271 : vector<8x128xf32>
    %278 = arith.select %5, %277, %276 : vector<8x128xi1>, vector<8x128xf32>
    %279 = vector.extract_strided_slice %278 {offsets = [0, 0], sizes = [8, 32], strides = [1, 1]} : vector<8x128xf32> to vector<8x32xf32>
    %280 = vector.extract_strided_slice %278 {offsets = [0, 32], sizes = [8, 32], strides = [1, 1]} : vector<8x128xf32> to vector<8x32xf32>
    %281 = vector.extract_strided_slice %278 {offsets = [0, 64], sizes = [8, 32], strides = [1, 1]} : vector<8x128xf32> to vector<8x32xf32>
    %282 = vector.extract_strided_slice %278 {offsets = [0, 96], sizes = [8, 32], strides = [1, 1]} : vector<8x128xf32> to vector<8x32xf32>
    %283 = arith.mulf %280, %261 : vector<8x32xf32>
    %284 = arith.mulf %279, %281 : vector<8x32xf32>
    %285 = arith.addf %283, %284 : vector<8x32xf32>
    %286 = math.tanh %285 : vector<8x32xf32>
    %287 = arith.mulf %282, %286 : vector<8x32xf32>
    %288 = arith.index_cast %267 : i32 to index
    %c0_81 = arith.constant 0 : index
    %289 = vector.load %arg11[%288, %c0_81] : memref<64x32xf32, #tpu.memory_space<vmem>>, vector<8x32xf32>
    tpu.vector_store %arg11[%288, %c0_81], %287 {strides = array<i32>} : memref<64x32xf32, #tpu.memory_space<vmem>>, vector<8x32xf32>,
    %c3_i32_82 = arith.constant 3 : i32
    %c8_i32_83 = arith.constant 8 : i32
    %290 = arith.muli %c3_i32_82, %c8_i32_83 : i32
    %291 = tpu.assume_multiple %290, 8 : i32
    %292 = arith.index_cast %291 : i32 to index
    %c0_84 = arith.constant 0 : index
    %293 = vector.load %arg10[%292, %c0_84] : memref<64x128xf32, #tpu.memory_space<vmem>>, vector<8x128xf32>
    %cst_85 = arith.constant dense<0.000000e+00> : vector<8x128xf32>
    %294 = tpu.matmul %287, %215, %cst_85 {dimension_numbers = #tpu.dot_dimension_numbers<[1], [0], [0], [1], [0, 0, 1, 1], [], []>} : vector<8x32xf32>, vector<32x128xf32>, vector<8x128xf32> -> vector<8x128xf32>
    %295 = arith.addf %293, %294 : vector<8x128xf32>
    %296 = arith.negf %295 : vector<8x128xf32>
    %297 = math.exp %296 : vector<8x128xf32>
    %cst_86 = arith.constant 1.000000e+00 : f32
    %298 = vector.broadcast %cst_86 : f32 to vector<8x128xf32>
    %299 = arith.addf %298, %297 : vector<8x128xf32>
    %300 = arith.divf %298, %299 : vector<8x128xf32>
    %301 = math.tanh %295 : vector<8x128xf32>
    %302 = arith.select %5, %301, %300 : vector<8x128xi1>, vector<8x128xf32>
    %303 = vector.extract_strided_slice %302 {offsets = [0, 0], sizes = [8, 32], strides = [1, 1]} : vector<8x128xf32> to vector<8x32xf32>
    %304 = vector.extract_strided_slice %302 {offsets = [0, 32], sizes = [8, 32], strides = [1, 1]} : vector<8x128xf32> to vector<8x32xf32>
    %305 = vector.extract_strided_slice %302 {offsets = [0, 64], sizes = [8, 32], strides = [1, 1]} : vector<8x128xf32> to vector<8x32xf32>
    %306 = vector.extract_strided_slice %302 {offsets = [0, 96], sizes = [8, 32], strides = [1, 1]} : vector<8x128xf32> to vector<8x32xf32>
    %307 = arith.mulf %304, %285 : vector<8x32xf32>
    %308 = arith.mulf %303, %305 : vector<8x32xf32>
    %309 = arith.addf %307, %308 : vector<8x32xf32>
    %310 = math.tanh %309 : vector<8x32xf32>
    %311 = arith.mulf %306, %310 : vector<8x32xf32>
    %312 = arith.index_cast %291 : i32 to index
    %c0_87 = arith.constant 0 : index
    %313 = vector.load %arg11[%312, %c0_87] : memref<64x32xf32, #tpu.memory_space<vmem>>, vector<8x32xf32>
    tpu.vector_store %arg11[%312, %c0_87], %311 {strides = array<i32>} : memref<64x32xf32, #tpu.memory_space<vmem>>, vector<8x32xf32>,
    %c4_i32_88 = arith.constant 4 : i32
    %c8_i32_89 = arith.constant 8 : i32
    %314 = arith.muli %c4_i32_88, %c8_i32_89 : i32
    %315 = tpu.assume_multiple %314, 8 : i32
    %316 = arith.index_cast %315 : i32 to index
    %c0_90 = arith.constant 0 : index
    %317 = vector.load %arg10[%316, %c0_90] : memref<64x128xf32, #tpu.memory_space<vmem>>, vector<8x128xf32>
    %cst_91 = arith.constant dense<0.000000e+00> : vector<8x128xf32>
    %318 = tpu.matmul %311, %215, %cst_91 {dimension_numbers = #tpu.dot_dimension_numbers<[1], [0], [0], [1], [0, 0, 1, 1], [], []>} : vector<8x32xf32>, vector<32x128xf32>, vector<8x128xf32> -> vector<8x128xf32>
    %319 = arith.addf %317, %318 : vector<8x128xf32>
    %320 = arith.negf %319 : vector<8x128xf32>
    %321 = math.exp %320 : vector<8x128xf32>
    %cst_92 = arith.constant 1.000000e+00 : f32
    %322 = vector.broadcast %cst_92 : f32 to vector<8x128xf32>
    %323 = arith.addf %322, %321 : vector<8x128xf32>
    %324 = arith.divf %322, %323 : vector<8x128xf32>
    %325 = math.tanh %319 : vector<8x128xf32>
    %326 = arith.select %5, %325, %324 : vector<8x128xi1>, vector<8x128xf32>
    %327 = vector.extract_strided_slice %326 {offsets = [0, 0], sizes = [8, 32], strides = [1, 1]} : vector<8x128xf32> to vector<8x32xf32>
    %328 = vector.extract_strided_slice %326 {offsets = [0, 32], sizes = [8, 32], strides = [1, 1]} : vector<8x128xf32> to vector<8x32xf32>
    %329 = vector.extract_strided_slice %326 {offsets = [0, 64], sizes = [8, 32], strides = [1, 1]} : vector<8x128xf32> to vector<8x32xf32>
    %330 = vector.extract_strided_slice %326 {offsets = [0, 96], sizes = [8, 32], strides = [1, 1]} : vector<8x128xf32> to vector<8x32xf32>
    %331 = arith.mulf %328, %309 : vector<8x32xf32>
    %332 = arith.mulf %327, %329 : vector<8x32xf32>
    %333 = arith.addf %331, %332 : vector<8x32xf32>
    %334 = math.tanh %333 : vector<8x32xf32>
    %335 = arith.mulf %330, %334 : vector<8x32xf32>
    %336 = arith.index_cast %315 : i32 to index
    %c0_93 = arith.constant 0 : index
    %337 = vector.load %arg11[%336, %c0_93] : memref<64x32xf32, #tpu.memory_space<vmem>>, vector<8x32xf32>
    tpu.vector_store %arg11[%336, %c0_93], %335 {strides = array<i32>} : memref<64x32xf32, #tpu.memory_space<vmem>>, vector<8x32xf32>,
    %c5_i32_94 = arith.constant 5 : i32
    %c8_i32_95 = arith.constant 8 : i32
    %338 = arith.muli %c5_i32_94, %c8_i32_95 : i32
    %339 = tpu.assume_multiple %338, 8 : i32
    %340 = arith.index_cast %339 : i32 to index
    %c0_96 = arith.constant 0 : index
    %341 = vector.load %arg10[%340, %c0_96] : memref<64x128xf32, #tpu.memory_space<vmem>>, vector<8x128xf32>
    %cst_97 = arith.constant dense<0.000000e+00> : vector<8x128xf32>
    %342 = tpu.matmul %335, %215, %cst_97 {dimension_numbers = #tpu.dot_dimension_numbers<[1], [0], [0], [1], [0, 0, 1, 1], [], []>} : vector<8x32xf32>, vector<32x128xf32>, vector<8x128xf32> -> vector<8x128xf32>
    %343 = arith.addf %341, %342 : vector<8x128xf32>
    %344 = arith.negf %343 : vector<8x128xf32>
    %345 = math.exp %344 : vector<8x128xf32>
    %cst_98 = arith.constant 1.000000e+00 : f32
    %346 = vector.broadcast %cst_98 : f32 to vector<8x128xf32>
    %347 = arith.addf %346, %345 : vector<8x128xf32>
    %348 = arith.divf %346, %347 : vector<8x128xf32>
    %349 = math.tanh %343 : vector<8x128xf32>
    %350 = arith.select %5, %349, %348 : vector<8x128xi1>, vector<8x128xf32>
    %351 = vector.extract_strided_slice %350 {offsets = [0, 0], sizes = [8, 32], strides = [1, 1]} : vector<8x128xf32> to vector<8x32xf32>
    %352 = vector.extract_strided_slice %350 {offsets = [0, 32], sizes = [8, 32], strides = [1, 1]} : vector<8x128xf32> to vector<8x32xf32>
    %353 = vector.extract_strided_slice %350 {offsets = [0, 64], sizes = [8, 32], strides = [1, 1]} : vector<8x128xf32> to vector<8x32xf32>
    %354 = vector.extract_strided_slice %350 {offsets = [0, 96], sizes = [8, 32], strides = [1, 1]} : vector<8x128xf32> to vector<8x32xf32>
    %355 = arith.mulf %352, %333 : vector<8x32xf32>
    %356 = arith.mulf %351, %353 : vector<8x32xf32>
    %357 = arith.addf %355, %356 : vector<8x32xf32>
    %358 = math.tanh %357 : vector<8x32xf32>
    %359 = arith.mulf %354, %358 : vector<8x32xf32>
    %360 = arith.index_cast %339 : i32 to index
    %c0_99 = arith.constant 0 : index
    %361 = vector.load %arg11[%360, %c0_99] : memref<64x32xf32, #tpu.memory_space<vmem>>, vector<8x32xf32>
    tpu.vector_store %arg11[%360, %c0_99], %359 {strides = array<i32>} : memref<64x32xf32, #tpu.memory_space<vmem>>, vector<8x32xf32>,
    %c6_i32_100 = arith.constant 6 : i32
    %c8_i32_101 = arith.constant 8 : i32
    %362 = arith.muli %c6_i32_100, %c8_i32_101 : i32
    %363 = tpu.assume_multiple %362, 8 : i32
    %364 = arith.index_cast %363 : i32 to index
    %c0_102 = arith.constant 0 : index
    %365 = vector.load %arg10[%364, %c0_102] : memref<64x128xf32, #tpu.memory_space<vmem>>, vector<8x128xf32>
    %cst_103 = arith.constant dense<0.000000e+00> : vector<8x128xf32>
    %366 = tpu.matmul %359, %215, %cst_103 {dimension_numbers = #tpu.dot_dimension_numbers<[1], [0], [0], [1], [0, 0, 1, 1], [], []>} : vector<8x32xf32>, vector<32x128xf32>, vector<8x128xf32> -> vector<8x128xf32>
    %367 = arith.addf %365, %366 : vector<8x128xf32>
    %368 = arith.negf %367 : vector<8x128xf32>
    %369 = math.exp %368 : vector<8x128xf32>
    %cst_104 = arith.constant 1.000000e+00 : f32
    %370 = vector.broadcast %cst_104 : f32 to vector<8x128xf32>
    %371 = arith.addf %370, %369 : vector<8x128xf32>
    %372 = arith.divf %370, %371 : vector<8x128xf32>
    %373 = math.tanh %367 : vector<8x128xf32>
    %374 = arith.select %5, %373, %372 : vector<8x128xi1>, vector<8x128xf32>
    %375 = vector.extract_strided_slice %374 {offsets = [0, 0], sizes = [8, 32], strides = [1, 1]} : vector<8x128xf32> to vector<8x32xf32>
    %376 = vector.extract_strided_slice %374 {offsets = [0, 32], sizes = [8, 32], strides = [1, 1]} : vector<8x128xf32> to vector<8x32xf32>
    %377 = vector.extract_strided_slice %374 {offsets = [0, 64], sizes = [8, 32], strides = [1, 1]} : vector<8x128xf32> to vector<8x32xf32>
    %378 = vector.extract_strided_slice %374 {offsets = [0, 96], sizes = [8, 32], strides = [1, 1]} : vector<8x128xf32> to vector<8x32xf32>
    %379 = arith.mulf %376, %357 : vector<8x32xf32>
    %380 = arith.mulf %375, %377 : vector<8x32xf32>
    %381 = arith.addf %379, %380 : vector<8x32xf32>
    %382 = math.tanh %381 : vector<8x32xf32>
    %383 = arith.mulf %378, %382 : vector<8x32xf32>
    %384 = arith.index_cast %363 : i32 to index
    %c0_105 = arith.constant 0 : index
    %385 = vector.load %arg11[%384, %c0_105] : memref<64x32xf32, #tpu.memory_space<vmem>>, vector<8x32xf32>
    tpu.vector_store %arg11[%384, %c0_105], %383 {strides = array<i32>} : memref<64x32xf32, #tpu.memory_space<vmem>>, vector<8x32xf32>,
    %c7_i32_106 = arith.constant 7 : i32
    %c8_i32_107 = arith.constant 8 : i32
    %386 = arith.muli %c7_i32_106, %c8_i32_107 : i32
    %387 = tpu.assume_multiple %386, 8 : i32
    %388 = arith.index_cast %387 : i32 to index
    %c0_108 = arith.constant 0 : index
    %389 = vector.load %arg10[%388, %c0_108] : memref<64x128xf32, #tpu.memory_space<vmem>>, vector<8x128xf32>
    %cst_109 = arith.constant dense<0.000000e+00> : vector<8x128xf32>
    %390 = tpu.matmul %383, %215, %cst_109 {dimension_numbers = #tpu.dot_dimension_numbers<[1], [0], [0], [1], [0, 0, 1, 1], [], []>} : vector<8x32xf32>, vector<32x128xf32>, vector<8x128xf32> -> vector<8x128xf32>
    %391 = arith.addf %389, %390 : vector<8x128xf32>
    %392 = arith.negf %391 : vector<8x128xf32>
    %393 = math.exp %392 : vector<8x128xf32>
    %cst_110 = arith.constant 1.000000e+00 : f32
    %394 = vector.broadcast %cst_110 : f32 to vector<8x128xf32>
    %395 = arith.addf %394, %393 : vector<8x128xf32>
    %396 = arith.divf %394, %395 : vector<8x128xf32>
    %397 = math.tanh %391 : vector<8x128xf32>
    %398 = arith.select %5, %397, %396 : vector<8x128xi1>, vector<8x128xf32>
    %399 = vector.extract_strided_slice %398 {offsets = [0, 0], sizes = [8, 32], strides = [1, 1]} : vector<8x128xf32> to vector<8x32xf32>
    %400 = vector.extract_strided_slice %398 {offsets = [0, 32], sizes = [8, 32], strides = [1, 1]} : vector<8x128xf32> to vector<8x32xf32>
    %401 = vector.extract_strided_slice %398 {offsets = [0, 64], sizes = [8, 32], strides = [1, 1]} : vector<8x128xf32> to vector<8x32xf32>
    %402 = vector.extract_strided_slice %398 {offsets = [0, 96], sizes = [8, 32], strides = [1, 1]} : vector<8x128xf32> to vector<8x32xf32>
    %403 = arith.mulf %400, %381 : vector<8x32xf32>
    %404 = arith.mulf %399, %401 : vector<8x32xf32>
    %405 = arith.addf %403, %404 : vector<8x32xf32>
    %406 = math.tanh %405 : vector<8x32xf32>
    %407 = arith.mulf %402, %406 : vector<8x32xf32>
    %408 = arith.index_cast %387 : i32 to index
    %c0_111 = arith.constant 0 : index
    %409 = vector.load %arg11[%408, %c0_111] : memref<64x32xf32, #tpu.memory_space<vmem>>, vector<8x32xf32>
    tpu.vector_store %arg11[%408, %c0_111], %407 {strides = array<i32>} : memref<64x32xf32, #tpu.memory_space<vmem>>, vector<8x32xf32>,
    %c8_i32_112 = arith.constant 8 : i32
    %c0_113 = arith.constant 0 : index
    %c0_114 = arith.constant 0 : index
    %410 = vector.load %arg11[%c0_113, %c0_114] : memref<64x32xf32, #tpu.memory_space<vmem>>, vector<64x32xf32>
    %c0_115 = arith.constant 0 : index
    %c0_116 = arith.constant 0 : index
    %411 = vector.load %arg7[%c0_115, %c0_116] : memref<32x128xf32, #tpu.memory_space<vmem>>, vector<32x128xf32>
    %cst_117 = arith.constant dense<0.000000e+00> : vector<64x128xf32>
    %412 = tpu.matmul %410, %411, %cst_117 {dimension_numbers = #tpu.dot_dimension_numbers<[1], [0], [0], [1], [0, 0, 1, 1], [], []>} : vector<64x32xf32>, vector<32x128xf32>, vector<64x128xf32> -> vector<64x128xf32>
    %c0_118 = arith.constant 0 : index
    %c0_119 = arith.constant 0 : index
    %413 = vector.load %arg8[%c0_118, %c0_119] : memref<1x128xf32, #tpu.memory_space<vmem>>, vector<1x128xf32>
    %414 = vector.broadcast %413 : vector<1x128xf32> to vector<64x128xf32>
    %415 = arith.addf %412, %414 : vector<64x128xf32>
    %c0_120 = arith.constant 0 : index
    %c0_121 = arith.constant 0 : index
    %416 = vector.load %arg9[%c0_120, %c0_121] : memref<64x128xf32, #tpu.memory_space<vmem>>, vector<64x128xf32>
    tpu.vector_store %arg9[%c0_120, %c0_121], %415 {strides = array<i32>} : memref<64x128xf32, #tpu.memory_space<vmem>>, vector<64x128xf32>,
    return
  }
}

</mosaic_0001>

<bundles_post_ra>
// kernel: simple_recurrent_sequence_forward.1
= control target key start
LH: loop header
LB: loop body
LE: loop exit
PB: predicated region body
PF: predicated region fallthrough
CT: control target
= control target key end

     0   :  { %vm53_vm0 = vcmask 64512   ;;  %v2840_v8 = vmov 0.0|0.0   ;;  %vm2841_vm1 = vmmov 0   ;;  %v2842_v14 = vmov 0.0   ;;  %s2844_s10 = smov 32   ;;  %s3334_s1 = inlined_call_operand.vmem [shape: f32[8,128], index: 1, kind: input, shape index: {}]   ;;  %s3335_s0 = inlined_call_operand.vmem [shape: f32[64,8], index: 0, kind: input, shape index: {}]   ;;  %s3336_s2 = inlined_call_operand.vmem [shape: f32[32,128], index: 2, kind: input, shape index: {}]   ;;  %s3337_s3 = inlined_call_operand.vmem [shape: f32[1,128], index: 3, kind: input, shape index: {}]   ;;  %s3338_s4 = inlined_call_operand.vmem [shape: f32[32,128], index: 4, kind: input, shape index: {}]   ;;  %s3339_s5 = inlined_call_operand.vmem [shape: f32[32,128], index: 5, kind: input, shape index: {}]   ;;  %s3340_s6 = inlined_call_operand.vmem [shape: f32[1,128], index: 6, kind: input, shape index: {}]   ;;  %s3341_s7 = inlined_call_operand.vmem [shape: f32[32,128], index: 7, kind: input, shape index: {}]   ;;  %s3342_s8 = inlined_call_operand.vmem [shape: f32[1,128], index: 8, kind: input, shape index: {}]   ;;  %s3343_s9 = inlined_call_operand.vmem [shape: f32[64,128], index: 9, kind: output, shape index: {}]  }
   0x1   :  { %v45_v0 = vld [vmem:[%s3334_s1] sm:$0xff]  ;;  %v42_v2 = vld [vmem:[%s3335_s0 + $0x28] sm:$0xff]  ;;  %v43_v5 = vld [vmem:[%s3335_s0 + $0x30] sm:$0xff]  ;;  %v32_v28 = vlaneseq  ;;  %vm196_vm5 = vcmask 261120  }
   0x2   :  { %v41_v1 = vld [vmem:[%s3335_s0 + $0x20] sm:$0xff]  ;;  %2705 = vmatprep.subr.mxu1 %v45_v0  ;;  %v192_v4 = vld [vmem:[%s3336_s2 + $0x8] sm:$0xff]  ;;  %2363 = vmatprep.subr.mxu0 %v45_v0  ;;  %v193_v10 = vld [vmem:[%s3336_s2 + $0x10] sm:$0xff] }
   0x3   :  { %2371 = vmatprep.mubr.msk.f32.mxu1 %vm53_vm0, %v41_v1  ;;  %v191_v3 = vld [vmem:[%s3336_s2] sm:$0xff]  ;;  %2706 = vmatpush3.msra.mxu1 %v45_v0  ;;  %v38_v9 = vld [vmem:[%s3335_s0 + $0x8] sm:$0xff]  ;;  %v194_v11 = vld [vmem:[%s3336_s2 + $0x18] sm:$0xff]  ;;  %v33_v30 = vand.u32 127, %v32_v28 }
   0x4   :  { %v2914_v6 = vpack.c.bf16 %v192_v4, %v191_v3  ;;  %v37_v7 = vld [vmem:[%s3335_s0] sm:$0xff]  ;;  %2372 = vmatmul.mubr.msk.f32.vlgmr.msra.gmra.mrb[0].mxu1 %vm53_vm0, %v42_v2  ;;  %2593 = vmatprep.subr.bf16.mxu1 %v2840_v8  ;;  %v44_v12 = vld [vmem:[%s3335_s0 + $0x38] sm:$0xff]  ;;  %v2935_v13 = vpack.c.bf16 %v194_v11, %v193_v10  ;;  %v39_v59 = vld [vmem:[%s3335_s0 + $0x10] sm:$0xff] }
   0x5   :  { %2374 = vmatprep.mubr.msk.f32.mxu1 %vm53_vm0, %v43_v5  ;;  %2364 = vmatpush3.msra.mxu0 %v45_v0  ;;  %v2964_v18 = vld [vmem:[%s3337_s3] ss:$0 sm:$0xff]  ;;  %vm34_vm2 = vcmp.ge.s32.totalorder %v33_v30, 64  ;;  %vm35_vm3 = vcmp.lt.s32.totalorder %v33_v30, 96  ;;  %s2843_s3 = smov 64   ;;  %v40_v60 = vld [vmem:[%s3335_s0 + $0x18] sm:$0xff] }
   0x6   :  { %2595 = vmatpush3.bf16.msra.mxu1 %v2914_v6  ;;  %2365 = vmatprep.mubr.msk.f32.mxu0 %vm53_vm0, %v37_v7  ;;  %vm2971_vm4 = vmand %vm34_vm2, %vm35_vm3 }
   0x7   :  { %2596 = vmatprep.subr.bf16.mxu1 %v2840_v8  ;;  %2366 = vmatmul.mubr.msk.f32.vlgmr.msra.gmra.mrb[0].mxu0 %vm53_vm0, %v38_v9 }
   0x8   :  { %2375 = vmatmul.mubr.msk.f32.gmra.mrb[2].mxu1 %vm53_vm0, %v44_v12  ;;  %2605 = vmatprep.subr.bf16.mxu0 %v2840_v8 }
   0x9   :  { %2385 = vmatprep.mubr.msk.f32.mxu1 %vm2841_vm1, %v2842_v14  ;;  %2607 = vmatpush3.bf16.msra.mxu0 %v2914_v6 }
   0xa   :  { %2598 = vmatpush3.bf16.msra.mxu1 %v2935_v13  ;;  %2608 = vmatprep.subr.bf16.mxu0 %v2840_v8 }
   0xb   :  { %2599 = vmatprep.subr.bf16.mxu1 %v2840_v8  ;;  %2368 = vmatprep.mubr.msk.f32.mxu0 %vm53_vm0, %v39_v59 }
   0xc   :  { %2369 = vmatmul.mubr.msk.f32.gmra.mrb[2].mxu0 %vm53_vm0, %v40_v60 }
   0xd   :  { %2386 = vmatmul.mubr.f32.vlgmr.msra.gmra.mrb[4].mxu1 %v2842_v14  ;;  %2610 = vmatpush3.bf16.msra.mxu0 %v2935_v13 }
   0xe   :  { %2601 = vmatpush3.bf16.msra.mxu1 %v2914_v6  ;;  %2396 = vmatprep.mubr.msk.f32.mxu1 %vm2841_vm1, %v2842_v14 }
   0xf   :  { %2602 = vmatprep.subr.bf16.mxu1 %v2840_v8  ;;  %2617 = vmatprep.subr.bf16.mxu0 %v2840_v8 }
  0x10   :  { %2407 = vmatprep.mubr.msk.f32.mxu0 %vm2841_vm1, %v2842_v14 }
  0x12   :  { %2604 = vmatpush3.bf16.msra.mxu1 %v2935_v13 }
  0x13   :  { %2611 = vmatprep.subr.bf16.mxu1 %v2840_v8 }
  0xd7   :  { %v2957_v15 = vpop.f32.mrb[0].mxu1 }
  0xd8   :  { %v2959_v16 = vpop.f32.mrb[1].mxu1 }
  0xda   :  { %v2367_v17 = vpop.f32.mrb[0].mxu0 }
  0xdb   :  { %v2966_v19 = vpop.f32.mrb[2].mxu1  ;;  %v144_v20 = vpop.f32.mrb[1].mxu0  ;;  %v150_v44 = vadd.f32 %v2367_v17, %v2964_v18 }
  0xdc   :  { %v2968_v21 = vpop.f32.mrb[3].mxu1  ;;  %v145_v22 = vadd.f32 %v2964_v18, %v144_v20 }
  0xdf   :  { %v2370_v0 = vpop.f32.mrb[2].mxu0 }
  0xe0   :  { %v266_v23 = vpop.f32.mrb[4].mxu1  ;;  %v154_v1 = vpop.f32.mrb[3].mxu0 }
  0xe1   :  { %v270_v24 = vadd.f32 %v266_v23, %v145_v22  ;;  %v2387_v25 = vpop.f32.mrb[5].mxu1  ;;  %v155_v3 = vadd.f32 %v2964_v18, %v154_v1 }
  0xe3   :  { %v2202_v26 = vmul.f32 -1.442695, %v270_v24 }
  0xe5   :  { %2712 = vpow2.f32 %v2202_v26 }
  0xe6   :  { %2714 = vtanh.f32 %v270_v24 }
  0xef   :  { %v2713_v27 = vpop.eup %2712 }
  0xf0   :  { %v274_v29 = vadd.f32 1.0, %v2713_v27  ;;  %v2715_v32 = vpop.eup %2714 }
  0xf2   :  { %2716 = vrcp.f32 %v274_v29 }
  0xfc   :  { %v2717_v33 = vpop.eup %2716 }
  0xfd   :  { %v278_v34 = vsel %vm2971_vm4, %v2715_v32, %v2717_v33  ;;  %v160_v32 = vadd.f32 %v2370_v0, %v2964_v18 }
  0xfe   :  { %281 = vrot.lane.b32.xlu0 %v278_v34, %s2843_s3  ;;  %v279_v37 = vmul.f32 0.0, %v278_v34 }
 0x170   :  { %v282_v35 = vpop.permute.xlu0 %281 }
 0x171   :  { %v284_v36 = vmul.f32 %v282_v35, %v278_v34 }
 0x173   :  { %286 = vrot.lane.b32.xlu0 %v284_v36, %s2844_s10 }
 0x1e5   :  { %v287_v38 = vpop.permute.xlu0 %286 }
 0x1e6   :  { %v289_v39 = vadd.f32 %v287_v38, %v279_v37 }
 0x1e8   :  { %2718 = vtanh.f32 %v289_v39 }
 0x1f2   :  { %v2719_v40 = vpop.eup %2718 }
 0x1f3   :  { %292 = vrot.lane.b32.xlu1 %v2719_v40, %s2843_s3 }
 0x265   :  { %v293_v41 = vpop.permute.xlu1 %292 }
 0x266   :  { %v295_v42 = vmul.f32 %v293_v41, %v278_v34 }
 0x268   :  { %297 = vrot.lane.b32.xlu1 %v295_v42, %s2844_s10 }
 0x2da   :  { %v298_v43 = vpop.permute.xlu1 %297 }
 0x2db   :  { %300 = vst.msk [vmem:[#allocation3] sm:$0xff] %vm196_vm5, %v298_v43  ;;  %2397 = vmatmul.mubr.msk.f32.vlgmr.msra.gmra.mrb[6].mxu1 %vm196_vm5, %v298_v43 }
 0x2dc   :  { %2613 = vmatpush3.bf16.msra.mxu1 %v2914_v6  ;;  %2418 = vmatprep.mubr.msk.f32.mxu1 %vm2841_vm1, %v2842_v14 }
 0x2dd   :  { %2614 = vmatprep.subr.bf16.mxu1 %v2840_v8 }
 0x2e0   :  { %2616 = vmatpush3.bf16.msra.mxu1 %v2935_v13 }
 0x2e1   :  { %2623 = vmatprep.subr.bf16.mxu1 %v2840_v8 }
 0x3ae   :  { %v371_v45 = vpop.f32.mrb[6].mxu1 }
 0x3af   :  { %v375_v46 = vadd.f32 %v371_v45, %v150_v44  ;;  %v2398_v47 = vpop.f32.mrb[7].mxu1 }
 0x3b1   :  { %v2204_v48 = vmul.f32 -1.442695, %v375_v46 }
 0x3b3   :  { %2720 = vpow2.f32 %v2204_v48 }
 0x3b4   :  { %2722 = vtanh.f32 %v375_v46 }
 0x3bd   :  { %v2721_v49 = vpop.eup %2720 }
 0x3be   :  { %v379_v50 = vadd.f32 1.0, %v2721_v49  ;;  %v2723_v51 = vpop.eup %2722 }
 0x3c0   :  { %2724 = vrcp.f32 %v379_v50 }
 0x3ca   :  { %v2725_v52 = vpop.eup %2724 }
 0x3cb   :  { %v383_v53 = vsel %vm2971_vm4, %v2723_v51, %v2725_v52  ;;  %v165_v51 = vadd.f32 %v2964_v18, %v2959_v16 }
 0x3cc   :  { %386 = vrot.lane.b32.xlu0 %v383_v53, %s2843_s3  ;;  %v384_v56 = vmul.f32 %v383_v53, %v289_v39 }
 0x43e   :  { %v387_v54 = vpop.permute.xlu0 %386 }
 0x43f   :  { %v389_v55 = vmul.f32 %v387_v54, %v383_v53 }
 0x441   :  { %391 = vrot.lane.b32.xlu1 %v389_v55, %s2844_s10 }
 0x4b3   :  { %v392_v57 = vpop.permute.xlu1 %391 }
 0x4b4   :  { %v394_v58 = vadd.f32 %v392_v57, %v384_v56 }
 0x4b6   :  { %2726 = vtanh.f32 %v394_v58 }
 0x4c0   :  { %v2727_v61 = vpop.eup %2726 }
 0x4c1   :  { %397 = vrot.lane.b32.xlu0 %v2727_v61, %s2843_s3 }
 0x533   :  { %v398_v62 = vpop.permute.xlu0 %397 }
 0x534   :  { %v400_v63 = vmul.f32 %v398_v62, %v383_v53 }
 0x536   :  { %402 = vrot.lane.b32.xlu1 %v400_v63, %s2844_s10 }
 0x5a8   :  { %v403_v2 = vpop.permute.xlu1 %402 }
 0x5a9   :  { %406 = vst.msk [vmem:[#allocation3 + $0x8] sm:$0xff] %vm196_vm5, %v403_v2  ;;  %2408 = vmatmul.mubr.msk.f32.vlgmr.msra.gmra.mrb[4].mxu0 %vm196_vm5, %v403_v2 }
 0x5aa   :  { %2619 = vmatpush3.bf16.msra.mxu0 %v2914_v6  ;;  %2429 = vmatprep.mubr.msk.f32.mxu0 %vm2841_vm1, %v2842_v14 }
 0x5ab   :  { %2620 = vmatprep.subr.bf16.mxu0 %v2840_v8 }
 0x5ae   :  { %2622 = vmatpush3.bf16.msra.mxu0 %v2935_v13 }
 0x5af   :  { %2629 = vmatprep.subr.bf16.mxu0 %v2840_v8 }
 0x67c   :  { %v477_v4 = vpop.f32.mrb[4].mxu0 }
 0x67d   :  { %v481_v5 = vadd.f32 %v477_v4, %v155_v3  ;;  %v2409_v7 = vpop.f32.mrb[5].mxu0 }
 0x67f   :  { %v2206_v9 = vmul.f32 -1.442695, %v481_v5 }
 0x681   :  { %2728 = vpow2.f32 %v2206_v9 }
 0x682   :  { %2730 = vtanh.f32 %v481_v5  ;;  %v170_v5 = vadd.f32 %v2957_v15, %v2964_v18 }
 0x68b   :  { %v2729_v10 = vpop.eup %2728 }
 0x68c   :  { %v485_v11 = vadd.f32 1.0, %v2729_v10  ;;  %v2731_v12 = vpop.eup %2730 }
 0x68e   :  { %2732 = vrcp.f32 %v485_v11 }
 0x698   :  { %v2733_v17 = vpop.eup %2732 }
 0x699   :  { %v489_v20 = vsel %vm2971_vm4, %v2731_v12, %v2733_v17 }
 0x69a   :  { %492 = vrot.lane.b32.xlu0 %v489_v20, %s2843_s3  ;;  %v490_v24 = vmul.f32 %v489_v20, %v394_v58 }
 0x70c   :  { %v493_v22 = vpop.permute.xlu0 %492 }
 0x70d   :  { %v495_v23 = vmul.f32 %v493_v22, %v489_v20 }
 0x70f   :  { %497 = vrot.lane.b32.xlu1 %v495_v23, %s2844_s10 }
 0x781   :  { %v498_v25 = vpop.permute.xlu1 %497 }
 0x782   :  { %v500_v26 = vadd.f32 %v498_v25, %v490_v24 }
 0x784   :  { %2734 = vtanh.f32 %v500_v26 }
 0x78e   :  { %v2735_v27 = vpop.eup %2734 }
 0x78f   :  { %503 = vrot.lane.b32.xlu0 %v2735_v27, %s2843_s3  ;;  %v1052_v27 = vld [vmem:[%s3338_s4 + $0x8] sm:$0xff] }
 0x801   :  { %v504_v28 = vpop.permute.xlu0 %503 }
 0x802   :  { %v506_v29 = vmul.f32 %v504_v28, %v489_v20 }
 0x804   :  { %508 = vrot.lane.b32.xlu1 %v506_v29, %s2844_s10 }
 0x876   :  { %v509_v30 = vpop.permute.xlu1 %508 }
 0x877   :  { %512 = vst.msk [vmem:[#allocation3 + $0x10] sm:$0xff] %vm196_vm5, %v509_v30  ;;  %2419 = vmatmul.mubr.msk.f32.vlgmr.msra.gmra.mrb[8].mxu1 %vm196_vm5, %v509_v30 }
 0x878   :  { %2625 = vmatpush3.bf16.msra.mxu1 %v2914_v6  ;;  %2440 = vmatprep.mubr.msk.f32.mxu1 %vm2841_vm1, %v2842_v14 }
 0x879   :  { %2626 = vmatprep.subr.bf16.mxu1 %v2840_v8 }
 0x87c   :  { %2628 = vmatpush3.bf16.msra.mxu1 %v2935_v13 }
 0x87d   :  { %2635 = vmatprep.subr.bf16.mxu1 %v2840_v8 }
 0x94a   :  { %v583_v33 = vpop.f32.mrb[8].mxu1 }
 0x94b   :  { %v587_v34 = vadd.f32 %v583_v33, %v160_v32  ;;  %v2420_v35 = vpop.f32.mrb[9].mxu1  ;;  %v1053_v33 = vld [vmem:[%s3338_s4 + $0x10] sm:$0xff] }
 0x94d   :  { %v2208_v36 = vmul.f32 -1.442695, %v587_v34 }
 0x94f   :  { %2736 = vpow2.f32 %v2208_v36 }
 0x950   :  { %2738 = vtanh.f32 %v587_v34  ;;  %v1054_v34 = vld [vmem:[%s3338_s4 + $0x18] sm:$0xff] }
 0x951   :  { %v2645_v35 = vpack.c.bf16 %v1054_v34, %v1053_v33 }
 0x959   :  { %v2737_v37 = vpop.eup %2736 }
 0x95a   :  { %v591_v38 = vadd.f32 1.0, %v2737_v37  ;;  %v2739_v39 = vpop.eup %2738  ;;  %v1043_v37 = vld [vmem:[#allocation3] sm:$0xff] }
 0x95c   :  { %2740 = vrcp.f32 %v591_v38  ;;  %v1044_v38 = vld [vmem:[#allocation3 + $0x8] sm:$0xff] }
 0x966   :  { %v2741_v40 = vpop.eup %2740 }
 0x967   :  { %v595_v41 = vsel %vm2971_vm4, %v2739_v39, %v2741_v40  ;;  %v1045_v39 = vld [vmem:[#allocation3 + $0x10] sm:$0xff] }
 0x968   :  { %598 = vrot.lane.b32.xlu0 %v595_v41, %s2843_s3  ;;  %v596_v44 = vmul.f32 %v595_v41, %v500_v26  ;;  %v1051_v26 = vld [vmem:[%s3338_s4] sm:$0xff] }
 0x969   :  { %v2641_v28 = vpack.c.bf16 %v1052_v27, %v1051_v26 }
 0x9da   :  { %v599_v42 = vpop.permute.xlu0 %598 }
 0x9db   :  { %v601_v43 = vmul.f32 %v599_v42, %v595_v41 }
 0x9dd   :  { %603 = vrot.lane.b32.xlu1 %v601_v43, %s2844_s10  ;;  %v175_v43 = vadd.f32 %v2964_v18, %v2968_v21 }
 0xa4f   :  { %v604_v45 = vpop.permute.xlu1 %603 }
 0xa50   :  { %v606_v46 = vadd.f32 %v604_v45, %v596_v44 }
 0xa52   :  { %2742 = vtanh.f32 %v606_v46 }
 0xa5c   :  { %v2743_v47 = vpop.eup %2742 }
 0xa5d   :  { %609 = vrot.lane.b32.xlu0 %v2743_v47, %s2843_s3 }
 0xacf   :  { %v610_v48 = vpop.permute.xlu0 %609 }
 0xad0   :  { %v612_v49 = vmul.f32 %v610_v48, %v595_v41 }
 0xad2   :  { %614 = vrot.lane.b32.xlu1 %v612_v49, %s2844_s10 }
 0xb44   :  { %v615_v50 = vpop.permute.xlu1 %614 }
 0xb45   :  { %618 = vst.msk [vmem:[#allocation3 + $0x18] sm:$0xff] %vm196_vm5, %v615_v50  ;;  %2430 = vmatmul.mubr.msk.f32.vlgmr.msra.gmra.mrb[6].mxu0 %vm196_vm5, %v615_v50 }
 0xb46   :  { %2631 = vmatpush3.bf16.msra.mxu0 %v2914_v6  ;;  %2451 = vmatprep.mubr.msk.f32.mxu0 %vm2841_vm1, %v2842_v14 }
 0xb47   :  { %2632 = vmatprep.subr.bf16.mxu0 %v2840_v8 }
 0xb4a   :  { %2634 = vmatpush3.bf16.msra.mxu0 %v2935_v13 }
 0xb4b   :  { %2642 = vmatprep.subr.bf16.mxu0 %v2641_v28 }
 0xb4c   :  { %v1046_v40 = vld [vmem:[#allocation3 + $0x18] sm:$0xff] }
 0xc18   :  { %v689_v52 = vpop.f32.mrb[6].mxu0 }
 0xc19   :  { %v693_v53 = vadd.f32 %v689_v52, %v165_v51  ;;  %v2431_v54 = vpop.f32.mrb[7].mxu0 }
 0xc1b   :  { %v2210_v55 = vmul.f32 -1.442695, %v693_v53 }
 0xc1d   :  { %2744 = vpow2.f32 %v2210_v55 }
 0xc1e   :  { %2746 = vtanh.f32 %v693_v53 }
 0xc27   :  { %v2745_v56 = vpop.eup %2744 }
 0xc28   :  { %v697_v57 = vadd.f32 1.0, %v2745_v56  ;;  %v2747_v58 = vpop.eup %2746 }
 0xc2a   :  { %2748 = vrcp.f32 %v697_v57 }
 0xc34   :  { %v2749_v59 = vpop.eup %2748 }
 0xc35   :  { %v701_v60 = vsel %vm2971_vm4, %v2747_v58, %v2749_v59 }
 0xc36   :  { %704 = vrot.lane.b32.xlu0 %v701_v60, %s2843_s3  ;;  %v702_v16 = vmul.f32 %v701_v60, %v606_v46 }
 0xca8   :  { %v705_v61 = vpop.permute.xlu0 %704 }
 0xca9   :  { %v707_v62 = vmul.f32 %v705_v61, %v701_v60 }
 0xcab   :  { %709 = vrot.lane.b32.xlu1 %v707_v62, %s2844_s10 }
 0xd1d   :  { %v710_v63 = vpop.permute.xlu1 %709 }
 0xd1e   :  { %v712_v0 = vadd.f32 %v710_v63, %v702_v16  ;;  %v1199_v63 = vld [vmem:[%s3339_s5] sm:$0xff] }
 0xd20   :  { %2750 = vtanh.f32 %v712_v0 }
 0xd2a   :  { %v2751_v1 = vpop.eup %2750 }
 0xd2b   :  { %715 = vrot.lane.b32.xlu0 %v2751_v1, %s2843_s3 }
 0xd9d   :  { %v716_v2 = vpop.permute.xlu0 %715 }
 0xd9e   :  { %v718_v3 = vmul.f32 %v716_v2, %v701_v60  ;;  %v1201_v2 = vld [vmem:[%s3339_s5 + $0x10] sm:$0xff] }
 0xda0   :  { %720 = vrot.lane.b32.xlu1 %v718_v3, %s2844_s10  ;;  %v1202_v3 = vld [vmem:[%s3339_s5 + $0x18] sm:$0xff] }
 0xe12   :  { %v721_v4 = vpop.permute.xlu1 %720 }
 0xe13   :  { %724 = vst.msk [vmem:[#allocation3 + $0x20] sm:$0xff] %vm196_vm5, %v721_v4  ;;  %2441 = vmatmul.mubr.msk.f32.vlgmr.msra.gmra.mrb[10].mxu1 %vm196_vm5, %v721_v4  ;;  %v3124_v4 = vpack.c.bf16 %v1202_v3, %v1201_v2 }
 0xe14   :  { %2637 = vmatpush3.bf16.msra.mxu1 %v2914_v6  ;;  %2462 = vmatprep.mubr.msk.f32.mxu1 %vm2841_vm1, %v2842_v14 }
 0xe15   :  { %2638 = vmatprep.subr.bf16.mxu1 %v2840_v8 }
 0xe18   :  { %2640 = vmatpush3.bf16.msra.mxu1 %v2935_v13 }
 0xe19   :  { %2649 = vmatprep.subr.bf16.mxu1 %v2840_v8 }
 0xe1a   :  { %v1047_v41 = vld [vmem:[#allocation3 + $0x20] sm:$0xff] }
 0xee6   :  { %v795_v7 = vpop.f32.mrb[10].mxu1 }
 0xee7   :  { %v799_v9 = vadd.f32 %v795_v7, %v170_v5  ;;  %v2442_v10 = vpop.f32.mrb[11].mxu1 }
 0xee9   :  { %v2212_v11 = vmul.f32 -1.442695, %v799_v9 }
 0xeeb   :  { %2752 = vpow2.f32 %v2212_v11  ;;  %v180_v11 = vadd.f32 %v2966_v19, %v2964_v18 }
 0xeec   :  { %2754 = vtanh.f32 %v799_v9 }
 0xef5   :  { %v2753_v12 = vpop.eup %2752 }
 0xef6   :  { %v803_v17 = vadd.f32 1.0, %v2753_v12  ;;  %v2755_v6 = vpop.eup %2754 }
 0xef8   :  { %2756 = vrcp.f32 %v803_v17 }
 0xf02   :  { %v2757_v20 = vpop.eup %2756 }
 0xf03   :  { %v807_v22 = vsel %vm2971_vm4, %v2755_v6, %v2757_v20  ;;  %v3150_v20 = vld [vmem:[%s3340_s6] ss:$0 sm:$0xff] }
 0xf04   :  { %810 = vrot.lane.b32.xlu0 %v807_v22, %s2843_s3  ;;  %v808_v15 = vmul.f32 %v807_v22, %v712_v0  ;;  %v1200_v0 = vld [vmem:[%s3339_s5 + $0x8] sm:$0xff] }
 0xf05   :  { %v3114_v1 = vpack.c.bf16 %v1200_v0, %v1199_v63 }
 0xf76   :  { %v811_v13 = vpop.permute.xlu0 %810 }
 0xf77   :  { %v813_v23 = vmul.f32 %v811_v13, %v807_v22 }
 0xf79   :  { %815 = vrot.lane.b32.xlu1 %v813_v23, %s2844_s10 }
 0xfeb   :  { %v816_v24 = vpop.permute.xlu1 %815 }
 0xfec   :  { %v818_v25 = vadd.f32 %v816_v24, %v808_v15 }
 0xfee   :  { %2758 = vtanh.f32 %v818_v25 }
 0xff8   :  { %v2759_v29 = vpop.eup %2758 }
 0xff9   :  { %821 = vrot.lane.b32.xlu0 %v2759_v29, %s2843_s3 }
0x106b   :  { %v822_v30 = vpop.permute.xlu0 %821 }
0x106c   :  { %v824_v32 = vmul.f32 %v822_v30, %v807_v22 }
0x106e   :  { %826 = vrot.lane.b32.xlu1 %v824_v32, %s2844_s10 }
0x10e0   :  { %v827_v36 = vpop.permute.xlu1 %826 }
0x10e1   :  { %830 = vst.msk [vmem:[#allocation3 + $0x28] sm:$0xff] %vm196_vm5, %v827_v36  ;;  %2452 = vmatmul.mubr.msk.f32.vlgmr.msra.gmra.mrb[8].mxu0 %vm196_vm5, %v827_v36 }
0x10e2   :  { %2644 = vmatpush3.bf16.msra.mxu0 %v2641_v28  ;;  %2473 = vmatprep.mubr.msk.f32.mxu0 %vm196_vm5, %v1043_v37 }
0x10e3   :  { %2646 = vmatprep.subr.bf16.mxu0 %v2645_v35 }
0x10e6   :  { %2648 = vmatpush3.bf16.msra.mxu0 %v2645_v35 }
0x10e7   :  { %2661 = vmatprep.subr.bf16.mxu0 %v2840_v8 }
0x10e8   :  { %v1048_v42 = vld [vmem:[#allocation3 + $0x28] sm:$0xff] }
0x10e9   :  { %2474 = vmatmul.mubr.msk.f32.vlgmr.msra.gmra.mrb[10].mxu0 %vm196_vm5, %v1044_v38 }
0x10ea   :  { %2476 = vmatprep.mubr.msk.f32.mxu0 %vm196_vm5, %v1045_v39  ;;  %2663 = vmatpush3.bf16.msra.mxu0 %v3114_v1 }
0x10eb   :  { %2664 = vmatprep.subr.bf16.mxu0 %v2840_v8 }
0x10ed   :  { %2477 = vmatmul.mubr.msk.f32.gmra.mrb[12].mxu0 %vm196_vm5, %v1046_v40 }
0x10ee   :  { %2479 = vmatprep.mubr.msk.f32.mxu0 %vm196_vm5, %v1047_v41  ;;  %2666 = vmatpush3.bf16.msra.mxu0 %v3124_v4 }
0x10ef   :  { %2673 = vmatprep.subr.bf16.mxu0 %v2840_v8 }
0x10f1   :  { %2480 = vmatmul.mubr.msk.f32.gmra.mrb[14].mxu0 %vm196_vm5, %v1048_v42 }
0x11b4   :  { %v901_v44 = vpop.f32.mrb[8].mxu0 }
0x11b5   :  { %v905_v45 = vadd.f32 %v901_v44, %v175_v43  ;;  %v2453_v46 = vpop.f32.mrb[9].mxu0 }
0x11b7   :  { %v2214_v47 = vmul.f32 -1.442695, %v905_v45 }
0x11b9   :  { %2760 = vpow2.f32 %v2214_v47 }
0x11ba   :  { %2762 = vtanh.f32 %v905_v45 }
0x11bc   :  { %v3090_v48 = vpop.f32.mrb[10].mxu0 }
0x11bd   :  { %v1152_v49 = vpop.f32.mrb[11].mxu0 }
0x11be   :  { %v1153_v22 = vadd.f32 %v3150_v20, %v1152_v49 }
0x11c0   :  { %v3092_v50 = vpop.f32.mrb[12].mxu0 }
0x11c1   :  { %v3094_v51 = vpop.f32.mrb[13].mxu0 }
0x11c3   :  { %v2761_v52 = vpop.eup %2760 }
0x11c4   :  { %v909_v53 = vadd.f32 1.0, %v2761_v52  ;;  %v3096_v54 = vpop.f32.mrb[14].mxu0  ;;  %v2763_v21 = vpop.eup %2762 }
0x11c5   :  { %v3098_v55 = vpop.f32.mrb[15].mxu0 }
0x11c6   :  { %2764 = vrcp.f32 %v909_v53 }
0x11d0   :  { %v2765_v56 = vpop.eup %2764 }
0x11d1   :  { %v913_v57 = vsel %vm2971_vm4, %v2763_v21, %v2765_v56  ;;  %v1158_v56 = vadd.f32 %v3090_v48, %v3150_v20 }
0x11d2   :  { %916 = vrot.lane.b32.xlu0 %v913_v57, %s2843_s3  ;;  %v914_v60 = vmul.f32 %v913_v57, %v818_v25 }
0x1244   :  { %v917_v58 = vpop.permute.xlu0 %916 }
0x1245   :  { %v919_v59 = vmul.f32 %v917_v58, %v913_v57 }
0x1247   :  { %921 = vrot.lane.b32.xlu1 %v919_v59, %s2844_s10 }
0x12b9   :  { %v922_v61 = vpop.permute.xlu1 %921 }
0x12ba   :  { %v3104_v62 = vadd.f32 %v922_v61, %v914_v60 }
0x12bc   :  { %2766 = vtanh.f32 %v3104_v62 }
0x12c6   :  { %v2767_v16 = vpop.eup %2766 }
0x12c7   :  { %927 = vrot.lane.b32.xlu0 %v2767_v16, %s2843_s3 }
0x1339   :  { %v928_v5 = vpop.permute.xlu0 %927 }
0x133a   :  { %v930_v7 = vmul.f32 %v928_v5, %v913_v57 }
0x133c   :  { %932 = vrot.lane.b32.xlu1 %v930_v7, %s2844_s10 }
0x13ae   :  { %v933_v9 = vpop.permute.xlu1 %932 }
0x13af   :  { %936 = vst.msk [vmem:[#allocation3 + $0x30] sm:$0xff] %vm196_vm5, %v933_v9  ;;  %2463 = vmatmul.mubr.msk.f32.vlgmr.msra.gmra.mrb[12].mxu1 %vm196_vm5, %v933_v9 }
0x13b0   :  { %2651 = vmatpush3.bf16.msra.mxu1 %v3114_v1  ;;  %2493 = vmatprep.mubr.msk.f32.mxu1 %vm2841_vm1, %v2842_v14 }
0x13b1   :  { %2652 = vmatprep.subr.bf16.mxu1 %v2840_v8 }
0x13b4   :  { %2654 = vmatpush3.bf16.msra.mxu1 %v3124_v4 }
0x13b5   :  { %2655 = vmatprep.subr.bf16.mxu1 %v2840_v8 }
0x13b6   :  { %v1049_v10 = vld [vmem:[#allocation3 + $0x30] sm:$0xff] }
0x13b7   :  { %2494 = vmatmul.mubr.f32.vlgmr.msra.gmra.mrb[14].mxu1 %v2842_v14  ;;  %2482 = vmatprep.mubr.msk.f32.mxu0 %vm196_vm5, %v1049_v10 }
0x13b8   :  { %2657 = vmatpush3.bf16.msra.mxu1 %v3114_v1  ;;  %2504 = vmatprep.mubr.msk.f32.mxu1 %vm2841_vm1, %v2842_v14 }
0x13b9   :  { %2658 = vmatprep.subr.bf16.mxu1 %v2840_v8 }
0x13bc   :  { %2660 = vmatpush3.bf16.msra.mxu1 %v3124_v4 }
0x13bd   :  { %2667 = vmatprep.subr.bf16.mxu1 %v2840_v8 }
0x1482   :  { %v1007_v12 = vpop.f32.mrb[12].mxu1 }
0x1483   :  { %v1011_v17 = vadd.f32 %v1007_v12, %v180_v11  ;;  %v2464_v6 = vpop.f32.mrb[13].mxu1 }
0x1485   :  { %v2216_v30 = vmul.f32 -1.442695, %v1011_v17 }
0x148a   :  { %v1270_v13 = vpop.f32.mrb[14].mxu1 }
0x148b   :  { %v1274_v23 = vadd.f32 %v1270_v13, %v1153_v22  ;;  %v2495_v15 = vpop.f32.mrb[15].mxu1 }
0x148d   :  { %v2226_v24 = vmul.f32 -1.442695, %v1274_v23 }
0x148f   :  { %2768 = vpow2.f32 %v2226_v24 }
0x1490   :  { %2770 = vtanh.f32 %v1274_v23  ;;  %v1163_v23 = vadd.f32 %v3150_v20, %v3094_v51 }
0x1499   :  { %v2769_v25 = vpop.eup %2768 }
0x149a   :  { %v1278_v26 = vadd.f32 1.0, %v2769_v25  ;;  %v2771_v18 = vpop.eup %2770 }
0x149c   :  { %2772 = vrcp.f32 %v1278_v26 }
0x149d   :  { %2774 = vpow2.f32 %v2216_v30 }
0x14a6   :  { %v2773_v19 = vpop.eup %2772 }
0x14a7   :  { %v1282_v27 = vsel %vm2971_vm4, %v2771_v18, %v2773_v19  ;;  %v2775_v32 = vpop.eup %2774 }
0x14a8   :  { %1285 = vrot.lane.b32.xlu0 %v1282_v27, %s2843_s3  ;;  %v1283_v33 = vmul.f32 0.0, %v1282_v27  ;;  %v1015_v34 = vadd.f32 1.0, %v2775_v32 }
0x151a   :  { %v1286_v28 = vpop.permute.xlu0 %1285 }
0x151b   :  { %v1288_v29 = vmul.f32 %v1286_v28, %v1282_v27 }
0x151d   :  { %1290 = vrot.lane.b32.xlu1 %v1288_v29, %s2844_s10 }
0x158f   :  { %v1291_v35 = vpop.permute.xlu1 %1290 }
0x1590   :  { %v1293_v36 = vadd.f32 %v1291_v35, %v1283_v33 }
0x1592   :  { %2776 = vtanh.f32 %v1293_v36 }
0x1593   :  { %2778 = vrcp.f32 %v1015_v34 }
0x1594   :  { %2780 = vtanh.f32 %v1011_v17 }
0x159c   :  { %v2777_v37 = vpop.eup %2776 }
0x159d   :  { %v2779_v38 = vpop.eup %2778  ;;  %1296 = vrot.lane.b32.xlu0 %v2777_v37, %s2843_s3 }
0x159e   :  { %v2781_v39 = vpop.eup %2780 }
0x159f   :  { %v1019_v40 = vsel %vm2971_vm4, %v2781_v39, %v2779_v38  ;;  %v1168_v39 = vadd.f32 %v3092_v50, %v3150_v20 }
0x15a0   :  { %v1020_v46 = vmul.f32 %v1019_v40, %v3104_v62 }
0x15a1   :  { %1022 = vrot.lane.b32.xlu0 %v1019_v40, %s2843_s3 }
0x160f   :  { %v1297_v41 = vpop.permute.xlu0 %1296 }
0x1610   :  { %v1299_v42 = vmul.f32 %v1297_v41, %v1282_v27 }
0x1612   :  { %1301 = vrot.lane.b32.xlu1 %v1299_v42, %s2844_s10 }
0x1613   :  { %v1023_v43 = vpop.permute.xlu0 %1022 }
0x1614   :  { %v1025_v44 = vmul.f32 %v1023_v43, %v1019_v40 }
0x1616   :  { %1027 = vrot.lane.b32.xlu0 %v1025_v44, %s2844_s10 }
0x1684   :  { %v1302_v45 = vpop.permute.xlu1 %1301 }
0x1685   :  { %1304 = vst.msk [vmem:[#allocation3] sm:$0xff] %vm196_vm5, %v1302_v45  ;;  %2505 = vmatmul.mubr.msk.f32.vlgmr.msra.gmra.mrb[16].mxu1 %vm196_vm5, %v1302_v45 }
0x1686   :  { %2669 = vmatpush3.bf16.msra.mxu1 %v3114_v1  ;;  %2526 = vmatprep.mubr.msk.f32.mxu1 %vm2841_vm1, %v2842_v14 }
0x1687   :  { %2670 = vmatprep.subr.bf16.mxu1 %v2840_v8 }
0x1688   :  { %v1028_v47 = vpop.permute.xlu0 %1027 }
0x1689   :  { %v1030_v49 = vadd.f32 %v1028_v47, %v1020_v46 }
0x168a   :  { %2672 = vmatpush3.bf16.msra.mxu1 %v3124_v4 }
0x168b   :  { %2782 = vtanh.f32 %v1030_v49  ;;  %2679 = vmatprep.subr.bf16.mxu1 %v2840_v8 }
0x1695   :  { %v2783_v52 = vpop.eup %2782 }
0x1696   :  { %1033 = vrot.lane.b32.xlu0 %v2783_v52, %s2843_s3 }
0x1708   :  { %v1034_v53 = vpop.permute.xlu0 %1033 }
0x1709   :  { %v1036_v21 = vmul.f32 %v1034_v53, %v1019_v40 }
0x170b   :  { %1038 = vrot.lane.b32.xlu0 %v1036_v21, %s2844_s10 }
0x1758   :  { %v1374_v57 = vpop.f32.mrb[16].mxu1 }
0x1759   :  { %v1378_v58 = vadd.f32 %v1374_v57, %v1158_v56  ;;  %v2506_v59 = vpop.f32.mrb[17].mxu1 }
0x175b   :  { %v2228_v60 = vmul.f32 -1.442695, %v1378_v58 }
0x175d   :  { %2784 = vpow2.f32 %v2228_v60 }
0x175e   :  { %2786 = vtanh.f32 %v1378_v58 }
0x1767   :  { %v2785_v61 = vpop.eup %2784 }
0x1768   :  { %v1382_v62 = vadd.f32 1.0, %v2785_v61  ;;  %v2787_v16 = vpop.eup %2786  ;;  %v1173_v61 = vadd.f32 %v3150_v20, %v3098_v55 }
0x176a   :  { %2788 = vrcp.f32 %v1382_v62 }
0x1774   :  { %v2789_v63 = vpop.eup %2788 }
0x1775   :  { %v1386_v0 = vsel %vm2971_vm4, %v2787_v16, %v2789_v63 }
0x1776   :  { %1389 = vrot.lane.b32.xlu1 %v1386_v0, %s2843_s3  ;;  %v1387_v10 = vmul.f32 %v1386_v0, %v1293_v36 }
0x177d   :  { %v1039_v2 = vpop.permute.xlu0 %1038 }
0x177e   :  { %1042 = vst.msk [vmem:[#allocation3 + $0x38] sm:$0xff] %vm196_vm5, %v1039_v2 }
0x1785   :  { %v1050_v48 = vld [vmem:[#allocation3 + $0x38] sm:$0xff] }
0x1786   :  { %2483 = vmatmul.mubr.msk.f32.gmra.mrb[16].mxu0 %vm196_vm5, %v1050_v48 }
0x1787   :  { %2515 = vmatprep.mubr.msk.f32.mxu0 %vm2841_vm1, %v2842_v14 }
0x17e8   :  { %v1390_v3 = vpop.permute.xlu1 %1389 }
0x17e9   :  { %v1392_v5 = vmul.f32 %v1390_v3, %v1386_v0 }
0x17eb   :  { %1394 = vrot.lane.b32.xlu1 %v1392_v5, %s2844_s10 }
0x1859   :  { %v3184_v7 = vpop.f32.mrb[16].mxu0 }
0x185a   :  { %v3186_v9 = vpop.f32.mrb[17].mxu0 }
0x185d   :  { %v1395_v11 = vpop.permute.xlu1 %1394 }
0x185e   :  { %v1397_v12 = vadd.f32 %v1395_v11, %v1387_v10 }
0x1860   :  { %2790 = vtanh.f32 %v1397_v12 }
0x186a   :  { %v2791_v17 = vpop.eup %2790 }
0x186b   :  { %1400 = vrot.lane.b32.xlu1 %v2791_v17, %s2843_s3 }
0x18dd   :  { %v1401_v6 = vpop.permute.xlu1 %1400 }
0x18de   :  { %v1403_v22 = vmul.f32 %v1401_v6, %v1386_v0 }
0x18e0   :  { %1405 = vrot.lane.b32.xlu1 %v1403_v22, %s2844_s10 }
0x1952   :  { %v1406_v13 = vpop.permute.xlu1 %1405 }
0x1953   :  { %1408 = vst.msk [vmem:[#allocation3 + $0x8] sm:$0xff] %vm196_vm5, %v1406_v13  ;;  %2516 = vmatmul.mubr.msk.f32.vlgmr.msra.gmra.mrb[18].mxu0 %vm196_vm5, %v1406_v13 }
0x1954   :  { %2675 = vmatpush3.bf16.msra.mxu0 %v3114_v1  ;;  %2537 = vmatprep.mubr.msk.f32.mxu0 %vm2841_vm1, %v2842_v14 }
0x1955   :  { %2676 = vmatprep.subr.bf16.mxu0 %v2840_v8 }
0x1958   :  { %2678 = vmatpush3.bf16.msra.mxu0 %v3124_v4 }
0x1959   :  { %2685 = vmatprep.subr.bf16.mxu0 %v2840_v8 }
0x1a26   :  { %v1478_v15 = vpop.f32.mrb[18].mxu0 }
0x1a27   :  { %v1482_v24 = vadd.f32 %v1478_v15, %v1163_v23  ;;  %v2517_v25 = vpop.f32.mrb[19].mxu0 }
0x1a29   :  { %v2230_v26 = vmul.f32 -1.442695, %v1482_v24 }
0x1a2b   :  { %2792 = vpow2.f32 %v2230_v26 }
0x1a2c   :  { %2794 = vtanh.f32 %v1482_v24  ;;  %v1178_v24 = vadd.f32 %v3096_v54, %v3150_v20 }
0x1a35   :  { %v2793_v18 = vpop.eup %2792 }
0x1a36   :  { %v1486_v19 = vadd.f32 1.0, %v2793_v18  ;;  %v2795_v27 = vpop.eup %2794 }
0x1a38   :  { %2796 = vrcp.f32 %v1486_v19 }
0x1a42   :  { %v2797_v28 = vpop.eup %2796 }
0x1a43   :  { %v1490_v29 = vsel %vm2971_vm4, %v2795_v27, %v2797_v28 }
0x1a44   :  { %1493 = vrot.lane.b32.xlu0 %v1490_v29, %s2843_s3  ;;  %v1491_v51 = vmul.f32 %v1490_v29, %v1397_v12 }
0x1ab6   :  { %v1494_v30 = vpop.permute.xlu0 %1493 }
0x1ab7   :  { %v1496_v32 = vmul.f32 %v1494_v30, %v1490_v29 }
0x1ab9   :  { %1498 = vrot.lane.b32.xlu1 %v1496_v32, %s2844_s10 }
0x1b2b   :  { %v1499_v33 = vpop.permute.xlu1 %1498 }
0x1b2c   :  { %v1501_v34 = vadd.f32 %v1499_v33, %v1491_v51  ;;  %v2041_v51 = vld [vmem:[%s3341_s7] sm:$0xff]  ;;  %v2042_v33 = vld [vmem:[%s3341_s7 + $0x8] sm:$0xff] }
0x1b2e   :  { %2798 = vtanh.f32 %v1501_v34 }
0x1b38   :  { %v2799_v35 = vpop.eup %2798 }
0x1b39   :  { %1504 = vrot.lane.b32.xlu0 %v2799_v35, %s2843_s3 }
0x1bab   :  { %v1505_v36 = vpop.permute.xlu0 %1504 }
0x1bac   :  { %v1507_v37 = vmul.f32 %v1505_v36, %v1490_v29 }
0x1bae   :  { %1509 = vrot.lane.b32.xlu1 %v1507_v37, %s2844_s10 }
0x1c20   :  { %v1510_v38 = vpop.permute.xlu1 %1509 }
0x1c21   :  { %1512 = vst.msk [vmem:[#allocation3 + $0x10] sm:$0xff] %vm196_vm5, %v1510_v38  ;;  %2527 = vmatmul.mubr.msk.f32.vlgmr.msra.gmra.mrb[18].mxu1 %vm196_vm5, %v1510_v38  ;;  %v2043_v38 = vld [vmem:[%s3341_s7 + $0x10] sm:$0xff] }
0x1c22   :  { %2681 = vmatpush3.bf16.msra.mxu1 %v3114_v1  ;;  %2548 = vmatprep.mubr.msk.f32.mxu1 %vm2841_vm1, %v2842_v14 }
0x1c23   :  { %2682 = vmatprep.subr.bf16.mxu1 %v2840_v8 }
0x1c26   :  { %2684 = vmatpush3.bf16.msra.mxu1 %v3124_v4 }
0x1c27   :  { %2691 = vmatprep.subr.bf16.mxu1 %v2840_v8 }
0x1cf4   :  { %v1582_v40 = vpop.f32.mrb[18].mxu1 }
0x1cf5   :  { %v1586_v41 = vadd.f32 %v1582_v40, %v1168_v39  ;;  %v2528_v42 = vpop.f32.mrb[19].mxu1  ;;  %v2044_v39 = vld [vmem:[%s3341_s7 + $0x18] sm:$0xff] }
0x1cf6   :  { %v2701_v40 = vpack.c.bf16 %v2044_v39, %v2043_v38  ;;  %v2033_v42 = vld [vmem:[#allocation3] sm:$0xff] }
0x1cf7   :  { %v2232_v43 = vmul.f32 -1.442695, %v1586_v41 }
0x1cf9   :  { %2800 = vpow2.f32 %v2232_v43  ;;  %v2034_v43 = vld [vmem:[#allocation3 + $0x8] sm:$0xff] }
0x1cfa   :  { %2802 = vtanh.f32 %v1586_v41 }
0x1d03   :  { %v2801_v44 = vpop.eup %2800 }
0x1d04   :  { %v1590_v45 = vadd.f32 1.0, %v2801_v44  ;;  %v2803_v46 = vpop.eup %2802  ;;  %v2035_v44 = vld [vmem:[#allocation3 + $0x10] sm:$0xff] }
0x1d06   :  { %2804 = vrcp.f32 %v1590_v45 }
0x1d10   :  { %v2805_v47 = vpop.eup %2804 }
0x1d11   :  { %v1594_v49 = vsel %vm2971_vm4, %v2803_v46, %v2805_v47 }
0x1d12   :  { %1597 = vrot.lane.b32.xlu0 %v1594_v49, %s2843_s3  ;;  %v1595_v50 = vmul.f32 %v1594_v49, %v1501_v34  ;;  %v2697_v34 = vpack.c.bf16 %v2042_v33, %v2041_v51 }
0x1d84   :  { %v1598_v52 = vpop.permute.xlu0 %1597 }
0x1d85   :  { %v1600_v53 = vmul.f32 %v1598_v52, %v1594_v49 }
0x1d87   :  { %1602 = vrot.lane.b32.xlu1 %v1600_v53, %s2844_s10 }
0x1df9   :  { %v1603_v21 = vpop.permute.xlu1 %1602 }
0x1dfa   :  { %v1605_v56 = vadd.f32 %v1603_v21, %v1595_v50 }
0x1dfc   :  { %2806 = vtanh.f32 %v1605_v56 }
0x1e06   :  { %v2807_v57 = vpop.eup %2806 }
0x1e07   :  { %1608 = vrot.lane.b32.xlu0 %v2807_v57, %s2843_s3 }
0x1e79   :  { %v1609_v58 = vpop.permute.xlu0 %1608 }
0x1e7a   :  { %v1611_v59 = vmul.f32 %v1609_v58, %v1594_v49  ;;  %v1183_v49 = vadd.f32 %v3150_v20, %v3186_v9 }
0x1e7c   :  { %1613 = vrot.lane.b32.xlu1 %v1611_v59, %s2844_s10 }
0x1eee   :  { %v1614_v60 = vpop.permute.xlu1 %1613 }
0x1eef   :  { %1616 = vst.msk [vmem:[#allocation3 + $0x18] sm:$0xff] %vm196_vm5, %v1614_v60  ;;  %2538 = vmatmul.mubr.msk.f32.vlgmr.msra.gmra.mrb[20].mxu0 %vm196_vm5, %v1614_v60 }
0x1ef0   :  { %2687 = vmatpush3.bf16.msra.mxu0 %v3114_v1  ;;  %2559 = vmatprep.mubr.msk.f32.mxu0 %vm2841_vm1, %v2842_v14 }
0x1ef1   :  { %2688 = vmatprep.subr.bf16.mxu0 %v2840_v8 }
0x1ef4   :  { %2690 = vmatpush3.bf16.msra.mxu0 %v3124_v4 }
0x1ef5   :  { %2698 = vmatprep.subr.bf16.mxu0 %v2697_v34 }
0x1ef6   :  { %v2036_v45 = vld [vmem:[#allocation3 + $0x18] sm:$0xff] }
0x1fc2   :  { %v1686_v62 = vpop.f32.mrb[20].mxu0 }
0x1fc3   :  { %v1690_v16 = vadd.f32 %v1686_v62, %v1173_v61  ;;  %v2539_v63 = vpop.f32.mrb[21].mxu0 }
0x1fc5   :  { %v2234_v0 = vmul.f32 -1.442695, %v1690_v16 }
0x1fc7   :  { %2808 = vpow2.f32 %v2234_v0 }
0x1fc8   :  { %2810 = vtanh.f32 %v1690_v16 }
0x1fd1   :  { %v2809_v2 = vpop.eup %2808 }
0x1fd2   :  { %v1694_v48 = vadd.f32 1.0, %v2809_v2  ;;  %v2811_v3 = vpop.eup %2810 }
0x1fd4   :  { %2812 = vrcp.f32 %v1694_v48 }
0x1fde   :  { %v2813_v5 = vpop.eup %2812 }
0x1fdf   :  { %v1698_v10 = vsel %vm2971_vm4, %v2811_v3, %v2813_v5 }
0x1fe0   :  { %1701 = vrot.lane.b32.xlu0 %v1698_v10, %s2843_s3  ;;  %v1699_v55 = vmul.f32 %v1698_v10, %v1605_v56  ;;  %v3280_v56 = vld [vmem:[%s3342_s8] ss:$0 sm:$0xff] }
0x2052   :  { %v1702_v11 = vpop.permute.xlu0 %1701 }
0x2053   :  { %v1704_v12 = vmul.f32 %v1702_v11, %v1698_v10 }
0x2055   :  { %1706 = vrot.lane.b32.xlu1 %v1704_v12, %s2844_s10 }
0x20c7   :  { %v1707_v17 = vpop.permute.xlu1 %1706 }
0x20c8   :  { %v1709_v6 = vadd.f32 %v1707_v17, %v1699_v55 }
0x20ca   :  { %2814 = vtanh.f32 %v1709_v6 }
0x20d4   :  { %v2815_v22 = vpop.eup %2814 }
0x20d5   :  { %1712 = vrot.lane.b32.xlu0 %v2815_v22, %s2843_s3 }
0x2147   :  { %v1713_v13 = vpop.permute.xlu0 %1712 }
0x2148   :  { %v1715_v23 = vmul.f32 %v1713_v13, %v1698_v10 }
0x214a   :  { %1717 = vrot.lane.b32.xlu1 %v1715_v23, %s2844_s10 }
0x21bc   :  { %v1718_v15 = vpop.permute.xlu1 %1717 }
0x21bd   :  { %1720 = vst.msk [vmem:[#allocation3 + $0x20] sm:$0xff] %vm196_vm5, %v1718_v15  ;;  %2549 = vmatmul.mubr.msk.f32.vlgmr.msra.gmra.mrb[20].mxu1 %vm196_vm5, %v1718_v15 }
0x21be   :  { %2693 = vmatpush3.bf16.msra.mxu1 %v3114_v1  ;;  %2570 = vmatprep.mubr.msk.f32.mxu1 %vm2841_vm1, %v2842_v14 }
0x21bf   :  { %2694 = vmatprep.subr.bf16.mxu1 %v2840_v8 }
0x21c2   :  { %2696 = vmatpush3.bf16.msra.mxu1 %v3124_v4 }
0x21c4   :  { %v2037_v46 = vld [vmem:[#allocation3 + $0x20] sm:$0xff] }
0x2290   :  { %v1790_v25 = vpop.f32.mrb[20].mxu1 }
0x2291   :  { %v1794_v26 = vadd.f32 %v1790_v25, %v1178_v24  ;;  %v2550_v18 = vpop.f32.mrb[21].mxu1 }
0x2292   :  { %v1188_v18 = vadd.f32 %v3184_v7, %v3150_v20 }
0x2293   :  { %v2236_v19 = vmul.f32 -1.442695, %v1794_v26 }
0x2295   :  { %2816 = vpow2.f32 %v2236_v19 }
0x2296   :  { %2818 = vtanh.f32 %v1794_v26 }
0x229f   :  { %v2817_v27 = vpop.eup %2816 }
0x22a0   :  { %v1798_v28 = vadd.f32 1.0, %v2817_v27  ;;  %v2819_v1 = vpop.eup %2818 }
0x22a2   :  { %2820 = vrcp.f32 %v1798_v28 }
0x22ac   :  { %v2821_v29 = vpop.eup %2820 }
0x22ad   :  { %v1802_v14 = vsel %vm2971_vm4, %v2819_v1, %v2821_v29 }
0x22ae   :  { %1805 = vrot.lane.b32.xlu0 %v1802_v14, %s2843_s3  ;;  %v1803_v54 = vmul.f32 %v1802_v14, %v1709_v6 }
0x2320   :  { %v1806_v8 = vpop.permute.xlu0 %1805 }
0x2321   :  { %v1808_v4 = vmul.f32 %v1806_v8, %v1802_v14 }
0x2323   :  { %1810 = vrot.lane.b32.xlu1 %v1808_v4, %s2844_s10 }
0x2395   :  { %v1811_v30 = vpop.permute.xlu1 %1810 }
0x2396   :  { %v3250_v32 = vadd.f32 %v1811_v30, %v1803_v54 }
0x2398   :  { %2822 = vtanh.f32 %v3250_v32 }
0x23a2   :  { %v2823_v35 = vpop.eup %2822 }
0x23a3   :  { %1816 = vrot.lane.b32.xlu0 %v2823_v35, %s2843_s3 }
0x2415   :  { %v1817_v36 = vpop.permute.xlu0 %1816 }
0x2416   :  { %v1819_v37 = vmul.f32 %v1817_v36, %v1802_v14 }
0x2418   :  { %1821 = vrot.lane.b32.xlu1 %v1819_v37, %s2844_s10 }
0x248a   :  { %v1822_v41 = vpop.permute.xlu1 %1821 }
0x248b   :  { %1824 = vst.msk [vmem:[#allocation3 + $0x28] sm:$0xff] %vm196_vm5, %v1822_v41  ;;  %2560 = vmatmul.mubr.msk.f32.vlgmr.msra.gmra.mrb[22].mxu0 %vm196_vm5, %v1822_v41 }
0x248c   :  { %2700 = vmatpush3.bf16.msra.mxu0 %v2697_v34  ;;  %2581 = vmatprep.mubr.msk.f32.mxu0 %vm196_vm5, %v2033_v42 }
0x248d   :  { %2702 = vmatprep.subr.bf16.mxu0 %v2701_v40 }
0x2490   :  { %2704 = vmatpush3.bf16.msra.mxu0 %v2701_v40 }
0x2492   :  { %v2038_v47 = vld [vmem:[#allocation3 + $0x28] sm:$0xff] }
0x2493   :  { %2582 = vmatmul.mubr.msk.f32.vlgmr.msra.gmra.mrb[24].mxu0 %vm196_vm5, %v2034_v43 }
0x2494   :  { %2584 = vmatprep.mubr.msk.f32.mxu0 %vm196_vm5, %v2035_v44 }
0x2497   :  { %2585 = vmatmul.mubr.msk.f32.gmra.mrb[26].mxu0 %vm196_vm5, %v2036_v45 }
0x2498   :  { %2587 = vmatprep.mubr.msk.f32.mxu0 %vm196_vm5, %v2037_v46 }
0x249b   :  { %2588 = vmatmul.mubr.msk.f32.gmra.mrb[28].mxu0 %vm196_vm5, %v2038_v47 }
0x255e   :  { %v1894_v52 = vpop.f32.mrb[22].mxu0 }
0x255f   :  { %v1898_v53 = vadd.f32 %v1894_v52, %v1183_v49  ;;  %v2561_v50 = vpop.f32.mrb[23].mxu0 }
0x2561   :  { %v2238_v21 = vmul.f32 -1.442695, %v1898_v53 }
0x2563   :  { %2824 = vpow2.f32 %v2238_v21 }
0x2564   :  { %2826 = vtanh.f32 %v1898_v53 }
0x2566   :  { %v2583_v57 = vpop.f32.mrb[24].mxu0 }
0x2567   :  { %v2148_v58 = vadd.f32 %v2583_v57, %v3280_v56  ;;  %v2142_v59 = vpop.f32.mrb[25].mxu0 }
0x2568   :  { %v2143_v60 = vadd.f32 %v3280_v56, %v2142_v59 }
0x2569   :  { %2182 = vst [vmem:[%s3343_s9 + $0x8] sm:$0xff] %v2148_v58 }
0x256a   :  { %2181 = vst [vmem:[%s3343_s9] sm:$0xff] %v2143_v60  ;;  %v2586_v9 = vpop.f32.mrb[26].mxu0 }
0x256b   :  { %v2158_v61 = vadd.f32 %v2586_v9, %v3280_v56  ;;  %v2152_v62 = vpop.f32.mrb[27].mxu0 }
0x256c   :  { %v2153_v16 = vadd.f32 %v3280_v56, %v2152_v62 }
0x256d   :  { %v2825_v63 = vpop.eup %2824  ;;  %2184 = vst [vmem:[%s3343_s9 + $0x18] sm:$0xff] %v2158_v61 }
0x256e   :  { %v1902_v0 = vadd.f32 1.0, %v2825_v63  ;;  %2183 = vst [vmem:[%s3343_s9 + $0x10] sm:$0xff] %v2153_v16  ;;  %v2589_v2 = vpop.f32.mrb[28].mxu0  ;;  %v2827_v10 = vpop.eup %2826 }
0x256f   :  { %v2168_v48 = vadd.f32 %v2589_v2, %v3280_v56  ;;  %v2162_v3 = vpop.f32.mrb[29].mxu0 }
0x2570   :  { %2828 = vrcp.f32 %v1902_v0  ;;  %v2163_v5 = vadd.f32 %v3280_v56, %v2162_v3 }
0x2571   :  { %2186 = vst [vmem:[%s3343_s9 + $0x28] sm:$0xff] %v2168_v48 }
0x2572   :  { %2185 = vst [vmem:[%s3343_s9 + $0x20] sm:$0xff] %v2163_v5 }
0x257a   :  { %v2829_v11 = vpop.eup %2828 }
0x257b   :  { %v1906_v12 = vsel %vm2971_vm4, %v2827_v10, %v2829_v11 }
0x257c   :  { %1909 = vrot.lane.b32.xlu0 %v1906_v12, %s2843_s3  ;;  %v1907_v6 = vmul.f32 %v1906_v12, %v3250_v32 }
0x25ee   :  { %v1910_v55 = vpop.permute.xlu0 %1909 }
0x25ef   :  { %v1912_v17 = vmul.f32 %v1910_v55, %v1906_v12 }
0x25f1   :  { %1914 = vrot.lane.b32.xlu1 %v1912_v17, %s2844_s10 }
0x2663   :  { %v1915_v22 = vpop.permute.xlu1 %1914 }
0x2664   :  { %v1917_v13 = vadd.f32 %v1915_v22, %v1907_v6 }
0x2666   :  { %2830 = vtanh.f32 %v1917_v13 }
0x2670   :  { %v2831_v23 = vpop.eup %2830 }
0x2671   :  { %1920 = vrot.lane.b32.xlu0 %v2831_v23, %s2843_s3 }
0x26e3   :  { %v1921_v15 = vpop.permute.xlu0 %1920 }
0x26e4   :  { %v1923_v24 = vmul.f32 %v1921_v15, %v1906_v12 }
0x26e6   :  { %1925 = vrot.lane.b32.xlu1 %v1923_v24, %s2844_s10 }
0x2758   :  { %v1926_v25 = vpop.permute.xlu1 %1925 }
0x2759   :  { %1928 = vst.msk [vmem:[#allocation3 + $0x30] sm:$0xff] %vm196_vm5, %v1926_v25  ;;  %2571 = vmatmul.mubr.msk.f32.vlgmr.msra.gmra.mrb[22].mxu1 %vm196_vm5, %v1926_v25 }
0x2760   :  { %v2039_v26 = vld [vmem:[#allocation3 + $0x30] sm:$0xff] }
0x2761   :  { %2590 = vmatprep.mubr.msk.f32.mxu0 %vm196_vm5, %v2039_v26 }
0x282c   :  { %v1998_v19 = vpop.f32.mrb[22].mxu1 }
0x282d   :  { %v2002_v27 = vadd.f32 %v1998_v19, %v1188_v18  ;;  %v2572_v28 = vpop.f32.mrb[23].mxu1 }
0x282f   :  { %v2240_v1 = vmul.f32 -1.442695, %v2002_v27 }
0x2831   :  { %2832 = vpow2.f32 %v2240_v1 }
0x2832   :  { %2834 = vtanh.f32 %v2002_v27 }
0x283b   :  { %v2833_v29 = vpop.eup %2832 }
0x283c   :  { %v2006_v14 = vadd.f32 1.0, %v2833_v29  ;;  %v2835_v8 = vpop.eup %2834 }
0x283e   :  { %2836 = vrcp.f32 %v2006_v14 }
0x2848   :  { %v2837_v4 = vpop.eup %2836 }
0x2849   :  { %v2010_v54 = vsel %vm2971_vm4, %v2835_v8, %v2837_v4 }
0x284a   :  { %2013 = vrot.lane.b32.xlu0 %v2010_v54, %s2843_s3  ;;  %v2011_v20 = vmul.f32 %v2010_v54, %v1917_v13 }
0x28bc   :  { %v2014_v30 = vpop.permute.xlu0 %2013 }
0x28bd   :  { %v2016_v32 = vmul.f32 %v2014_v30, %v2010_v54 }
0x28bf   :  { %2018 = vrot.lane.b32.xlu1 %v2016_v32, %s2844_s10 }
0x2931   :  { %v2019_v7 = vpop.permute.xlu1 %2018 }
0x2932   :  { %v2021_v51 = vadd.f32 %v2019_v7, %v2011_v20 }
0x2934   :  { %2838 = vtanh.f32 %v2021_v51 }
0x293e   :  { %v2839_v33 = vpop.eup %2838 }
0x293f   :  { %2024 = vrot.lane.b32.xlu0 %v2839_v33, %s2843_s3 }
0x29b1   :  { %v2025_v34 = vpop.permute.xlu0 %2024 }
0x29b2   :  { %v2027_v35 = vmul.f32 %v2025_v34, %v2010_v54 }
0x29b4   :  { %2029 = vrot.lane.b32.xlu1 %v2027_v35, %s2844_s10 }
0x2a26   :  { %v2030_v36 = vpop.permute.xlu1 %2029 }
0x2a27   :  { %2032 = vst.msk [vmem:[#allocation3 + $0x38] sm:$0xff] %vm196_vm5, %v2030_v36 }
0x2a2e   :  { %v2040_v31 = vld [vmem:[#allocation3 + $0x38] sm:$0xff] }
0x2a2f   :  { %2591 = vmatmul.mubr.msk.f32.gmra.mrb[30].mxu0 %vm196_vm5, %v2040_v31 }
0x2b02   :  { %v2592_v37 = vpop.f32.mrb[30].mxu0 }
0x2b03   :  { %v2178_v38 = vadd.f32 %v2592_v37, %v3280_v56  ;;  %v2172_v39 = vpop.f32.mrb[31].mxu0 }
0x2b04   :  { %v2173_v40 = vadd.f32 %v3280_v56, %v2172_v39 }
0x2b05   :  { %2188 = vst [vmem:[%s3343_s9 + $0x38] sm:$0xff] %v2178_v38 }
0x2b06   :  { %2187 = vst [vmem:[%s3343_s9 + $0x30] sm:$0xff] %v2173_v40 }

</bundles_post_ra>
